<compile_context>
chip_gen: v6e
topology: v6e:2x2x1
jax: 0.10.0
libtpu: 0.0.40
codegen_flags: <defaults>
</compile_context>

<pallas_src>
import math
from functools import partial

import numpy as np
import numpy.polynomial.polynomial as nppoly
import numpy.polynomial.legendre as npleg

import jax
import jax.numpy as jnp
from jax.experimental import pallas as pl
from jax.experimental.pallas import tpu as pltpu


# =====================================================================
# Filter construction (pure numpy, deterministic, 'legendre' base only)
# =====================================================================

def _legendre_power_coeffs(n):
    c = np.zeros(n + 1, dtype=np.float64)
    c[n] = 1.0
    return npleg.leg2poly(c)  # ascending power-basis coeffs of P_n(t)


def _poly_compose(c_outer, c_inner):
    res = np.array([c_outer[-1]], dtype=np.float64)
    for coef in c_outer[-2::-1]:
        res = nppoly.polymul(res, c_inner)
        res = nppoly.polyadd(res, np.array([coef], dtype=np.float64))
    return res


def _eval_legendre(n, x):
    c = np.zeros(n + 1, dtype=np.float64)
    c[n] = 1.0
    return npleg.legval(x, c)


def _legendre_der(k, x):
    out = 0.0
    for i in np.arange(k - 1, -1, -2):
        out = out + (2 * i + 1) * _eval_legendre(int(i), x)
    return out


def _get_phi_psi_legendre(k):
    phi_coeff = np.zeros((k, k))
    phi_2x_coeff = np.zeros((k, k))
    for ki in range(k):
        base = _legendre_power_coeffs(ki)
        c1 = _poly_compose(base, np.array([-1.0, 2.0]))  # P_ki(2x-1)
        phi_coeff[ki, :ki + 1] = np.sqrt(2 * ki + 1) * c1[:ki + 1]
        c2 = _poly_compose(base, np.array([-1.0, 4.0]))  # P_ki(4x-1)
        phi_2x_coeff[ki, :ki + 1] = np.sqrt(2) * np.sqrt(2 * ki + 1) * c2[:ki + 1]

    psi1_coeff = np.zeros((k, k))
    psi2_coeff = np.zeros((k, k))
    for ki in range(k):
        psi1_coeff[ki, :] = phi_2x_coeff[ki, :]
        for i in range(k):
            a = phi_2x_coeff[ki, :ki + 1]
            b = phi_coeff[i, :i + 1]
            prod_ = np.convolve(a, b)
            prod_[np.abs(prod_) < 1e-08] = 0
            proj_ = (prod_ * 1 / (np.arange(len(prod_)) + 1)
                     * np.power(0.5, 1 + np.arange(len(prod_)))).sum()
            psi1_coeff[ki, :] -= proj_ * phi_coeff[i, :]
            psi2_coeff[ki, :] -= proj_ * phi_coeff[i, :]
        for j in range(ki):
            a = phi_2x_coeff[ki, :ki + 1]
            b = psi1_coeff[j, :]
            prod_ = np.convolve(a, b)
            prod_[np.abs(prod_) < 1e-08] = 0
            proj_ = (prod_ * 1 / (np.arange(len(prod_)) + 1)
                     * np.power(0.5, 1 + np.arange(len(prod_)))).sum()
            psi1_coeff[ki, :] -= proj_ * psi1_coeff[j, :]
            psi2_coeff[ki, :] -= proj_ * psi2_coeff[j, :]
        a = psi1_coeff[ki, :]
        prod_ = np.convolve(a, a)
        prod_[np.abs(prod_) < 1e-08] = 0
        norm1 = (prod_ * 1 / (np.arange(len(prod_)) + 1)
                 * np.power(0.5, 1 + np.arange(len(prod_)))).sum()
        a = psi2_coeff[ki, :]
        prod_ = np.convolve(a, a)
        prod_[np.abs(prod_) < 1e-08] = 0
        norm2 = (prod_ * 1 / (np.arange(len(prod_)) + 1)
                 * (1 - np.power(0.5, 1 + np.arange(len(prod_))))).sum()
        norm_ = np.sqrt(norm1 + norm2)
        psi1_coeff[ki, :] /= norm_
        psi2_coeff[ki, :] /= norm_
        psi1_coeff[np.abs(psi1_coeff) < 1e-08] = 0
        psi2_coeff[np.abs(psi2_coeff) < 1e-08] = 0
    return phi_coeff, psi1_coeff, psi2_coeff


def get_filter_legendre(k):
    phi_coeff, psi1_coeff, psi2_coeff = _get_phi_psi_legendre(k)

    t, _ = npleg.leggauss(k)
    x_m = (t + 1.0) / 2.0
    tm = 2 * x_m - 1
    wm = 1 / k / _legendre_der(k, tm) / _eval_legendre(k - 1, tm)

    def phi_eval(i, x):
        return nppoly.polyval(x, phi_coeff[i])

    def psi_eval(i, x):
        mask = (x <= 0.5) * 1.0
        return (nppoly.polyval(x, psi1_coeff[i]) * mask
                + nppoly.polyval(x, psi2_coeff[i]) * (1 - mask))

    H0 = np.zeros((k, k)); H1 = np.zeros((k, k))
    G0 = np.zeros((k, k)); G1 = np.zeros((k, k))
    for ki in range(k):
        for kpi in range(k):
            H0[ki, kpi] = 1 / np.sqrt(2) * (wm * phi_eval(ki, x_m / 2) * phi_eval(kpi, x_m)).sum()
            G0[ki, kpi] = 1 / np.sqrt(2) * (wm * psi_eval(ki, x_m / 2) * phi_eval(kpi, x_m)).sum()
            H1[ki, kpi] = 1 / np.sqrt(2) * (wm * phi_eval(ki, (x_m + 1) / 2) * phi_eval(kpi, x_m)).sum()
            G1[ki, kpi] = 1 / np.sqrt(2) * (wm * psi_eval(ki, (x_m + 1) / 2) * phi_eval(kpi, x_m)).sum()
    PHI0 = np.eye(k)
    PHI1 = np.eye(k)
    for arr in (H0, H1, G0, G1):
        arr[np.abs(arr) < 1e-08] = 0
    return H0, H1, G0, G1, PHI0, PHI1


# =====================================================================
# Pallas kernels
# =====================================================================

_TILE_M = 2048                       # max rows per grid step (rows are G-grouped)
_VMEM_LIMIT = 32 * 1024 * 1024       # explicit scoped-VMEM headroom (<= v7x 64 MiB)

# TODO(synk): jnp.bfloat16 on v6e/v7x halves matmul-operand DMA; f32 keeps the
# 2e-4 cross-check against the original formulation passing unchanged.
_MM_DTYPE = jnp.float32


def _cparams():
    return pltpu.CompilerParams(dimension_semantics=("parallel",),
                                vmem_limit_bytes=_VMEM_LIMIT)


def _row_tile(m):
    """Big tiles, but keep >=2 grid steps on the parallel axis (v7x megacore)."""
    if m <= 16:
        return m
    t = ((m + 1) // 2 + 7) // 8 * 8
    return min(_TILE_M, t, m)


# ---- generic lane-dense grouped matmul (fused wavelet decompose) ------------

def _matmul_kernel(x_ref, w_ref, o_ref):
    o_ref[...] = jnp.dot(x_ref[...], w_ref[...], preferred_element_type=jnp.float32)


def grouped_matmul(x, w):
    """x: (M, K) grouped rows, w: (K, N) block-diag grouped weight -> (M, N) f32."""
    M, K = x.shape
    N = w.shape[1]
    TM = _row_tile(M)
    return pl.pallas_call(
        _matmul_kernel,
        grid=(pl.cdiv(M, TM),),
        in_specs=[pl.BlockSpec((TM, K), lambda i: (i, 0)),
                  pl.BlockSpec((K, N), lambda i: (0, 0))],
        out_specs=pl.BlockSpec((TM, N), lambda i: (i, 0)),
        out_shape=jax.ShapeDtypeStruct((M, N), jnp.float32),
        compiler_params=_cparams(),
    )(x.astype(_MM_DTYPE), w.astype(_MM_DTYPE))


# ---- T0 linear (Kronecker-expanded over channels + position groups) ---------

def _t0_kernel(x_ref, w_ref, b_ref, o_ref):
    o_ref[...] = (jnp.dot(x_ref[...], w_ref[...], preferred_element_type=jnp.float32)
                  + b_ref[...])


def t0_apply(x, w, b_row):
    M, K = x.shape
    N = w.shape[1]
    TM = _row_tile(M)
    return pl.pallas_call(
        _t0_kernel,
        grid=(pl.cdiv(M, TM),),
        in_specs=[pl.BlockSpec((TM, K), lambda i: (i, 0)),
                  pl.BlockSpec((K, N), lambda i: (0, 0)),
                  pl.BlockSpec((1, N), lambda i: (0, 0))],
        out_specs=pl.BlockSpec((TM, N), lambda i: (i, 0)),
        out_shape=jax.ShapeDtypeStruct((M, N), jnp.float32),
        compiler_params=_cparams(),
    )(x.astype(_MM_DTYPE), w.astype(_MM_DTYPE), b_row)


# ---- fused reconstruction:  x@W1 + [Ud|Us]@vstack(W2,W1) --------------------
#      == (x+Us)@W1 + Ud@W2, output [even(ck)|odd(ck)] per position -----------

def _rec_kernel(x_ref, z_ref, w1_ref, wz_ref, o_ref):
    o_ref[...] = (jnp.dot(x_ref[...], w1_ref[...], preferred_element_type=jnp.float32)
                  + jnp.dot(z_ref[...], wz_ref[...], preferred_element_type=jnp.float32))


def reconstruct(xg, zg, w1, wz):
    M, K1 = xg.shape
    K2 = zg.shape[1]
    N = w1.shape[1]
    TM = _row_tile(M)
    return pl.pallas_call(
        _rec_kernel,
        grid=(pl.cdiv(M, TM),),
        in_specs=[pl.BlockSpec((TM, K1), lambda i: (i, 0)),
                  pl.BlockSpec((TM, K2), lambda i: (i, 0)),
                  pl.BlockSpec((K1, N), lambda i: (0, 0)),
                  pl.BlockSpec((K2, N), lambda i: (0, 0))],
        out_specs=pl.BlockSpec((TM, N), lambda i: (i, 0)),
        out_shape=jax.ShapeDtypeStruct((M, N), jnp.float32),
        compiler_params=_cparams(),
    )(xg.astype(_MM_DTYPE), zg.astype(_MM_DTYPE),
      w1.astype(_MM_DTYPE), wz.astype(_MM_DTYPE))


# ---- fused spectral kernel: Ud = A(d)+B(s), Us = C(d) in frequency space ----
# Direct 4-multiply complex product; per-LHS concatenated weights:
#   WD = [A_wr | A_wi | C_wr | C_wi]   (LPAD, 4*LPAD)
#   WS = [B_wr | B_wi]                 (LPAD, 2*LPAD)
# Single wide output: [Ud_r | Ud_i | Us_r | Us_i]  (B, 4*LPAD).

def _spec_kernel(dr_ref, di_ref, sr_ref, si_ref, wd_ref, ws_ref, o_ref):
    L = wd_ref.shape[0]
    wd = wd_ref[...]
    ws = ws_ref[...]

    def _dot(a, w):
        return jnp.dot(a, w, preferred_element_type=jnp.float32)

    pd_r = _dot(dr_ref[...], wd)   # [dr@Awr | dr@Awi | dr@Cwr | dr@Cwi]
    pd_i = _dot(di_ref[...], wd)
    ps_r = _dot(sr_ref[...], ws)   # [sr@Bwr | sr@Bwi]
    ps_i = _dot(si_ref[...], ws)

    # complex product: out_r = xr@wr - xi@wi, out_i = xr@wi + xi@wr
    o_ref[:, 0:L]       = (pd_r[:, 0:L] - pd_i[:, L:2 * L]
                           + ps_r[:, 0:L] - ps_i[:, L:2 * L])           # Ud_r
    o_ref[:, L:2 * L]   = (pd_r[:, L:2 * L] + pd_i[:, 0:L]
                           + ps_r[:, L:2 * L] + ps_i[:, 0:L])           # Ud_i
    o_ref[:, 2 * L:3 * L] = pd_r[:, 2 * L:3 * L] - pd_i[:, 3 * L:4 * L]  # Us_r
    o_ref[:, 3 * L:4 * L] = pd_r[:, 3 * L:4 * L] + pd_i[:, 2 * L:3 * L]  # Us_i


def spectral_apply(dr, di, sr, si, wd, ws):
    Brows, LP = dr.shape
    TB = _row_tile(Brows)
    act = pl.BlockSpec((TB, LP), lambda i: (i, 0))
    return pl.pallas_call(
        _spec_kernel,
        grid=(pl.cdiv(Brows, TB),),
        in_specs=[act, act, act, act,
                  pl.BlockSpec((LP, 4 * LP), lambda i: (0, 0)),
                  pl.BlockSpec((LP, 2 * LP), lambda i: (0, 0))],
        out_specs=pl.BlockSpec((TB, 4 * LP), lambda i: (i, 0)),
        out_shape=jax.ShapeDtypeStruct((Brows, 4 * LP), jnp.float32),
        compiler_params=_cparams(),
    )(dr, di, sr, si, wd, ws)


# =====================================================================
# Grouping helpers (trace-time numpy; baked as constants under jit)
# =====================================================================

def _group_target(ck):
    g = 1
    while g * ck < 128 and g < 64:
        g *= 2
    return g


def _group_weight(w_np, G):
    if G == 1:
        return jnp.asarray(w_np)
    return jnp.asarray(np.kron(np.eye(G, dtype=w_np.dtype), w_np))


def _group_bias(b_np, G):
    return jnp.asarray(np.tile(b_np, G)[None, :])


# =====================================================================
# Optimized module forward (JAX glue = FFTs + free reshapes + tiny slices)
# =====================================================================

def mwt_cz1d_forward(x, *, prep, k, c, alpha, L=0):
    B, N, c_, k_ = x.shape
    assert c_ == c and k_ == k
    ck = c * k
    ns = math.floor(np.log2(N))
    nl = 2 ** math.ceil(np.log2(N))
    if nl > N:
        x = jnp.concatenate([x, x[:, :nl - N, :, :]], axis=1)
    xc = x.reshape(B, nl, ck).astype(jnp.float32)

    LPAD = prep['LPAD']
    WD = jnp.asarray(prep['WD'])
    WS = jnp.asarray(prep['WS'])
    G_tgt = _group_target(ck)

    UdUs = []                                    # per level: (B, Nh, 2ck) = [Ud | Us]
    for _ in range(ns - L):
        Nh = xc.shape[1] // 2
        G = min(G_tgt, Nh)                       # power-of-two, divides Nh
        rows = (B * Nh) // G

        # (1) fused wavelet decompose: one lane-dense grouped matmul -> [d | s]
        ds = grouped_matmul(xc.reshape(rows, G * 2 * ck),
                            _group_weight(prep['W_dec'], G))
        ds3 = ds.reshape(B, Nh, 2 * ck)

        # (2) ONE rfft per level (d and s share the feature axis)
        nf = Nh // 2 + 1
        l = min(alpha, nf)
        lck = l * ck
        ds_fft = jnp.fft.rfft(ds3, axis=1)[:, :l, :]
        pad = ((0, 0), (0, LPAD - lck))
        dr = jnp.pad(jnp.real(ds_fft[:, :, :ck]).reshape(B, lck), pad)
        di = jnp.pad(jnp.imag(ds_fft[:, :, :ck]).reshape(B, lck), pad)
        sr = jnp.pad(jnp.real(ds_fft[:, :, ck:]).reshape(B, lck), pad)
        si = jnp.pad(jnp.imag(ds_fft[:, :, ck:]).reshape(B, lck), pad)

        # (3) one fused spectral kernel (fixed LPAD shape for every level)
        spec = spectral_apply(dr, di, sr, si, WD, WS)          # (B, 4*LPAD)
        ud_spec = jax.lax.complex(spec[:, 0:lck],
                                  spec[:, LPAD:LPAD + lck]).reshape(B, l, ck)
        us_spec = jax.lax.complex(spec[:, 2 * LPAD:2 * LPAD + lck],
                                  spec[:, 3 * LPAD:3 * LPAD + lck]).reshape(B, l, ck)
        uds = jnp.concatenate([ud_spec, us_spec], axis=-1)     # (B, l, 2ck)
        if l < nf:
            uds = jnp.pad(uds, ((0, 0), (0, nf - l), (0, 0)))
        UdUs.append(jnp.fft.irfft(uds, n=Nh, axis=1))          # ONE irfft per level

        xc = ds3[:, :, ck:]                                    # s -> next level input

    # T0 linear at the coarsest scale
    Nc = xc.shape[1]
    Gt = min(G_tgt, Nc)
    rows = (B * Nc) // Gt
    y = t0_apply(xc.reshape(rows, Gt * ck),
                 _group_weight(prep['T0_K'], Gt),
                 _group_bias(prep['T0_b'], Gt))
    xc = y.reshape(B, Nc, ck)

    # reconstruction: residual + concat + dual matmul + even/odd interleave fused
    for i in range(ns - 1 - L, -1, -1):
        z3 = UdUs[i]                                           # (B, Nh, 2ck) = [Ud | Us]
        Nh = z3.shape[1]
        G = min(G_tgt, Nh)
        rows = (B * Nh) // G
        out = reconstruct(xc.reshape(rows, G * ck),
                          z3.reshape(rows, G * 2 * ck),
                          _group_weight(prep['W_rec1'], G),
                          _group_weight(prep['W_recz'], G))
        xc = out.reshape(B, 2 * Nh, ck)                        # free even/odd interleave

    return xc.reshape(B, nl, c, k)[:, :N, :, :]


# =====================================================================
# Pure-jnp reference (mirrors the original PyTorch math exactly)
# =====================================================================

def _sparse_kernel_ft1d_ref(x, w1, w2, modes1):
    B, N, c, k = x.shape
    ck = c * k
    xv = x.reshape(B, N, ck).transpose(0, 2, 1)
    x_fft = jnp.fft.rfft(xv, axis=-1)
    nf = N // 2 + 1
    l = min(modes1, nf)
    xl = x_fft[:, :, :l]
    wl = jax.lax.complex(w1, w2)[:, :, :l]
    out_l = jnp.einsum('bix,iox->box', xl, wl)
    out_ft = jnp.zeros((B, ck, nf), dtype=jnp.complex64).at[:, :, :l].set(out_l)
    xo = jnp.fft.irfft(out_ft, n=N, axis=-1)
    return xo.transpose(0, 2, 1).reshape(B, N, c, k)


def mwt_cz1d_reference(x, p, k, alpha, L=0):
    B, N, c, _ = x.shape
    ns = math.floor(np.log2(N))
    nl = 2 ** math.ceil(np.log2(N))
    if nl > N:
        x = jnp.concatenate([x, x[:, :nl - N, :, :]], axis=1)
    Ud = []
    Us = []
    for _ in range(ns - L):
        xa = jnp.concatenate([x[:, ::2, :, :], x[:, 1::2, :, :]], axis=-1)
        d = xa @ p['ec_d']
        x = xa @ p['ec_s']
        Ud.append(_sparse_kernel_ft1d_ref(d, p['A_w1'], p['A_w2'], alpha)
                  + _sparse_kernel_ft1d_ref(x, p['B_w1'], p['B_w2'], alpha))
        Us.append(_sparse_kernel_ft1d_ref(d, p['C_w1'], p['C_w2'], alpha))
    x = x @ p['T0_w'].T + p['T0_b']
    for i in range(ns - 1 - L, -1, -1):
        x = x + Us[i]
        x = jnp.concatenate([x, Ud[i]], axis=-1)
        x_e = x @ p['rc_e']
        x_o = x @ p['rc_o']
        x = jnp.stack([x_e, x_o], axis=2).reshape(B, 2 * x_e.shape[1], c, k)
    return x[:, :N, :, :]


# =====================================================================
# Parameter init + one-time kernel-ready weight preparation
# =====================================================================

def init_params(key, k, c, alpha):
    ck = c * k
    scale = 1.0 / (ck * ck)
    keys = jax.random.split(key, 8)
    p = {}
    for idx, name in enumerate(['A', 'B', 'C']):
        p[name + '_w1'] = scale * jax.random.uniform(keys[2 * idx], (ck, ck, alpha), dtype=jnp.float32)
        p[name + '_w2'] = scale * jax.random.uniform(keys[2 * idx + 1], (ck, ck, alpha), dtype=jnp.float32)
    bound = 1.0 / math.sqrt(k)
    p['T0_w'] = jax.random.uniform(keys[6], (k, k), minval=-bound, maxval=bound, dtype=jnp.float32)
    p['T0_b'] = jax.random.uniform(keys[7], (k,), minval=-bound, maxval=bound, dtype=jnp.float32)

    H0, H1, G0, G1, PHI0, PHI1 = get_filter_legendre(k)
    H0r = H0 @ PHI0
    G0r = G0 @ PHI0
    H1r = H1 @ PHI1
    G1r = G1 @ PHI1
    for arr in (H0r, H1r, G0r, G1r):
        arr[np.abs(arr) < 1e-08] = 0

    p['ec_s'] = jnp.asarray(np.concatenate((H0.T, H1.T), axis=0), dtype=jnp.float32)
    p['ec_d'] = jnp.asarray(np.concatenate((G0.T, G1.T), axis=0), dtype=jnp.float32)
    p['rc_e'] = jnp.asarray(np.concatenate((H0r, G0r), axis=0), dtype=jnp.float32)
    p['rc_o'] = jnp.asarray(np.concatenate((H1r, G1r), axis=0), dtype=jnp.float32)
    return p


def _mode_block_diag(w):
    """(ck, ck, a) weight -> (a*ck, a*ck) block-diagonal (mode-major) matrix."""
    w = np.asarray(w)
    ck, _, a = w.shape
    bd = np.zeros((a * ck, a * ck), dtype=np.float32)
    for m in range(a):
        bd[m * ck:(m + 1) * ck, m * ck:(m + 1) * ck] = w[:, :, m]
    return bd


def prepare_params(p, k, c, alpha):
    """Hoist all weight transposes / Kronecker / block-diag expansions out of the forward."""
    ck = c * k
    eye_c = np.eye(c)
    prep = {}

    # wavelet decomposition: rows [even(c,k) | odd(c,k)] -> [d(c,k) | s(c,k)] (fused)
    ec_d = np.asarray(p['ec_d'], dtype=np.float64)   # (2k, k)
    ec_s = np.asarray(p['ec_s'], dtype=np.float64)
    Wd = np.concatenate([np.kron(eye_c, ec_d[:k, :]), np.kron(eye_c, ec_d[k:, :])], axis=0)
    Ws = np.concatenate([np.kron(eye_c, ec_s[:k, :]), np.kron(eye_c, ec_s[k:, :])], axis=0)
    prep['W_dec'] = np.concatenate([Wd, Ws], axis=1).astype(np.float32)       # (2ck, 2ck)

    # reconstruction: x@W1 + [Ud|Us]@vstack(W2,W1) -> [even(c,k) | odd(c,k)]
    rc_e = np.asarray(p['rc_e'], dtype=np.float64)   # (2k, k)
    rc_o = np.asarray(p['rc_o'], dtype=np.float64)
    W1 = np.concatenate([np.kron(eye_c, rc_e[:k, :]), np.kron(eye_c, rc_o[:k, :])], axis=1)
    W2 = np.concatenate([np.kron(eye_c, rc_e[k:, :]), np.kron(eye_c, rc_o[k:, :])], axis=1)
    prep['W_rec1'] = W1.astype(np.float32)                                     # (ck, 2ck)
    prep['W_recz'] = np.concatenate([W2, W1], axis=0).astype(np.float32)       # (2ck, 2ck)

    # T0 linear: y = x @ W.T + b, Kronecker-expanded over channels
    T0_w = np.asarray(p['T0_w'], dtype=np.float64)
    T0_b = np.asarray(p['T0_b'], dtype=np.float64)
    prep['T0_K'] = np.kron(eye_c, T0_w.T).astype(np.float32)                   # (ck, ck)
    prep['T0_b'] = np.tile(T0_b, c).astype(np.float32)                         # (ck,)

    # spectral weights: mode-block-diagonal, zero-padded to a fixed lane-aligned LPAD,
    # concatenated per shared LHS (6 unique weight blocks streamed per level).
    LPAD = max(128, ((alpha * ck + 127) // 128) * 128)
    prep['LPAD'] = LPAD

    def bd_pad(w):
        bd = _mode_block_diag(w)
        out = np.zeros((LPAD, LPAD), dtype=np.float32)
        out[:bd.shape[0], :bd.shape[1]] = bd
        return out

    A_r, A_i = bd_pad(p['A_w1']), bd_pad(p['A_w2'])
    B_r, B_i = bd_pad(p['B_w1']), bd_pad(p['B_w2'])
    C_r, C_i = bd_pad(p['C_w1']), bd_pad(p['C_w2'])
    prep['WD'] = np.concatenate([A_r, A_i, C_r, C_i], axis=1)                  # (LPAD, 4*LPAD)
    prep['WS'] = np.concatenate([B_r, B_i], axis=1)                            # (LPAD, 2*LPAD)
    return prep


# =====================================================================

if __name__ == "__main__":
    k, c, alpha, L = 3, 4, 8, 0
    B, N = 2, 16

    key = jax.random.PRNGKey(0)
    pkey, xkey = jax.random.split(key)
    params = init_params(pkey, k, c, alpha)
    prep = prepare_params(params, k, c, alpha)
    x = jax.random.normal(xkey, (B, N, c, k), dtype=jnp.float32)

    fwd = jax.jit(partial(mwt_cz1d_forward, prep=prep, k=k, c=c, alpha=alpha, L=L))
    out = jax.block_until_ready(fwd(x))
    assert out.shape == (B, N, c, k)

    # cross-check against a pure-jnp reference of the ORIGINAL formulation
    ref = jax.block_until_ready(mwt_cz1d_reference(x, params, k=k, alpha=alpha, L=L))
    np.testing.assert_allclose(np.asarray(out), np.asarray(ref), rtol=2e-4, atol=2e-4)

    print("KERNEL_OK")
</pallas_src>

<mosaic_0001>
module attributes {stable_mosaic.version = 11 : i64} {
  func.func @_matmul_kernel(%arg0: i32, %arg1: memref<2x192xf32, #tpu.memory_space<vmem>>, %arg2: memref<192x192xf32, #tpu.memory_space<vmem>>, %arg3: memref<2x192xf32, #tpu.memory_space<vmem>>) attributes {dimension_semantics = [#tpu.dimension_semantics<parallel>], iteration_bounds = array<i64: 1>, scalar_prefetch = 0 : i64, scratch_operands = 0 : i64, tpu.core_type = #tpu.core_type<tc>, window_params = [{transform_indices = @transform_0, window_bounds = array<i64: 2, 192>}, {pipeline_mode = #tpu.pipeline_mode<synchronous>, transform_indices = @transform_1, window_bounds = array<i64: 192, 192>}, {transform_indices = @transform_2, window_bounds = array<i64: 2, 192>}]} {
    %c0 = arith.constant 0 : index
    %c0_0 = arith.constant 0 : index
    %0 = vector.load %arg1[%c0, %c0_0] : memref<2x192xf32, #tpu.memory_space<vmem>>, vector<2x192xf32>
    %c0_1 = arith.constant 0 : index
    %c0_2 = arith.constant 0 : index
    %1 = vector.load %arg2[%c0_1, %c0_2] : memref<192x192xf32, #tpu.memory_space<vmem>>, vector<192x192xf32>
    %cst = arith.constant dense<0.000000e+00> : vector<2x192xf32>
    %2 = tpu.matmul %0, %1, %cst {dimension_numbers = #tpu.dot_dimension_numbers<[1], [0], [0], [1], [0, 0, 1, 1], [], []>} : vector<2x192xf32>, vector<192x192xf32>, vector<2x192xf32> -> vector<2x192xf32>
    %c0_3 = arith.constant 0 : index
    %c0_4 = arith.constant 0 : index
    %3 = vector.load %arg3[%c0_3, %c0_4] : memref<2x192xf32, #tpu.memory_space<vmem>>, vector<2x192xf32>
    tpu.vector_store %arg3[%c0_3, %c0_4], %2 {strides = array<i32>} : memref<2x192xf32, #tpu.memory_space<vmem>>, vector<2x192xf32>,
    return
  }
  func.func @transform_0(%arg0: i32) -> (i32, i32) {
    %c0_i32 = arith.constant 0 : i32
    %c0_i32_0 = arith.constant 0 : i32
    return %arg0, %c0_i32 : i32, i32
  }
  func.func @transform_1(%arg0: i32) -> (i32, i32) {
    %c0_i32 = arith.constant 0 : i32
    %c0_i32_0 = arith.constant 0 : i32
    %c0_i32_1 = arith.constant 0 : i32
    return %c0_i32, %c0_i32_0 : i32, i32
  }
  func.func @transform_2(%arg0: i32) -> (i32, i32) {
    %c0_i32 = arith.constant 0 : i32
    %c0_i32_0 = arith.constant 0 : i32
    return %arg0, %c0_i32 : i32, i32
  }
}

module attributes {stable_mosaic.version = 11 : i64} {
  func.func @_spec_kernel(%arg0: i32, %arg1: memref<2x128xf32, #tpu.memory_space<vmem>>, %arg2: memref<2x128xf32, #tpu.memory_space<vmem>>, %arg3: memref<2x128xf32, #tpu.memory_space<vmem>>, %arg4: memref<2x128xf32, #tpu.memory_space<vmem>>, %arg5: memref<128x512xf32, #tpu.memory_space<vmem>>, %arg6: memref<128x256xf32, #tpu.memory_space<vmem>>, %arg7: memref<2x512xf32, #tpu.memory_space<vmem>>) attributes {dimension_semantics = [#tpu.dimension_semantics<parallel>], iteration_bounds = array<i64: 1>, scalar_prefetch = 0 : i64, scratch_operands = 0 : i64, tpu.core_type = #tpu.core_type<tc>, window_params = [{transform_indices = @transform_0, window_bounds = array<i64: 2, 128>}, {transform_indices = @transform_1, window_bounds = array<i64: 2, 128>}, {transform_indices = @transform_2, window_bounds = array<i64: 2, 128>}, {transform_indices = @transform_3, window_bounds = array<i64: 2, 128>}, {pipeline_mode = #tpu.pipeline_mode<synchronous>, transform_indices = @transform_4, window_bounds = array<i64: 128, 512>}, {pipeline_mode = #tpu.pipeline_mode<synchronous>, transform_indices = @transform_5, window_bounds = array<i64: 128, 256>}, {transform_indices = @transform_6, window_bounds = array<i64: 2, 512>}]} {
    %c0 = arith.constant 0 : index
    %c0_0 = arith.constant 0 : index
    %0 = vector.load %arg5[%c0, %c0_0] : memref<128x512xf32, #tpu.memory_space<vmem>>, vector<128x512xf32>
    %c0_1 = arith.constant 0 : index
    %c0_2 = arith.constant 0 : index
    %1 = vector.load %arg6[%c0_1, %c0_2] : memref<128x256xf32, #tpu.memory_space<vmem>>, vector<128x256xf32>
    %c0_3 = arith.constant 0 : index
    %c0_4 = arith.constant 0 : index
    %2 = vector.load %arg1[%c0_3, %c0_4] : memref<2x128xf32, #tpu.memory_space<vmem>>, vector<2x128xf32>
    %cst = arith.constant dense<0.000000e+00> : vector<2x512xf32>
    %3 = tpu.matmul %2, %0, %cst {dimension_numbers = #tpu.dot_dimension_numbers<[1], [0], [0], [1], [0, 0, 1, 1], [], []>} : vector<2x128xf32>, vector<128x512xf32>, vector<2x512xf32> -> vector<2x512xf32>
    %c0_5 = arith.constant 0 : index
    %c0_6 = arith.constant 0 : index
    %4 = vector.load %arg2[%c0_5, %c0_6] : memref<2x128xf32, #tpu.memory_space<vmem>>, vector<2x128xf32>
    %cst_7 = arith.constant dense<0.000000e+00> : vector<2x512xf32>
    %5 = tpu.matmul %4, %0, %cst_7 {dimension_numbers = #tpu.dot_dimension_numbers<[1], [0], [0], [1], [0, 0, 1, 1], [], []>} : vector<2x128xf32>, vector<128x512xf32>, vector<2x512xf32> -> vector<2x512xf32>
    %c0_8 = arith.constant 0 : index
    %c0_9 = arith.constant 0 : index
    %6 = vector.load %arg3[%c0_8, %c0_9] : memref<2x128xf32, #tpu.memory_space<vmem>>, vector<2x128xf32>
    %cst_10 = arith.constant dense<0.000000e+00> : vector<2x256xf32>
    %7 = tpu.matmul %6, %1, %cst_10 {dimension_numbers = #tpu.dot_dimension_numbers<[1], [0], [0], [1], [0, 0, 1, 1], [], []>} : vector<2x128xf32>, vector<128x256xf32>, vector<2x256xf32> -> vector<2x256xf32>
    %c0_11 = arith.constant 0 : index
    %c0_12 = arith.constant 0 : index
    %8 = vector.load %arg4[%c0_11, %c0_12] : memref<2x128xf32, #tpu.memory_space<vmem>>, vector<2x128xf32>
    %cst_13 = arith.constant dense<0.000000e+00> : vector<2x256xf32>
    %9 = tpu.matmul %8, %1, %cst_13 {dimension_numbers = #tpu.dot_dimension_numbers<[1], [0], [0], [1], [0, 0, 1, 1], [], []>} : vector<2x128xf32>, vector<128x256xf32>, vector<2x256xf32> -> vector<2x256xf32>
    %10 = vector.extract_strided_slice %3 {offsets = [0, 0], sizes = [2, 128], strides = [1, 1]} : vector<2x512xf32> to vector<2x128xf32>
    %11 = vector.extract_strided_slice %5 {offsets = [0, 128], sizes = [2, 128], strides = [1, 1]} : vector<2x512xf32> to vector<2x128xf32>
    %12 = arith.subf %10, %11 : vector<2x128xf32>
    %13 = vector.extract_strided_slice %7 {offsets = [0, 0], sizes = [2, 128], strides = [1, 1]} : vector<2x256xf32> to vector<2x128xf32>
    %14 = arith.addf %12, %13 : vector<2x128xf32>
    %15 = vector.extract_strided_slice %9 {offsets = [0, 128], sizes = [2, 128], strides = [1, 1]} : vector<2x256xf32> to vector<2x128xf32>
    %16 = arith.subf %14, %15 : vector<2x128xf32>
    %c0_14 = arith.constant 0 : index
    %c0_15 = arith.constant 0 : index
    %17 = vector.load %arg7[%c0_14, %c0_15] : memref<2x512xf32, #tpu.memory_space<vmem>>, vector<2x128xf32>
    tpu.vector_store %arg7[%c0_14, %c0_15], %16 {strides = array<i32>} : memref<2x512xf32, #tpu.memory_space<vmem>>, vector<2x128xf32>,
    %18 = vector.extract_strided_slice %3 {offsets = [0, 128], sizes = [2, 128], strides = [1, 1]} : vector<2x512xf32> to vector<2x128xf32>
    %19 = vector.extract_strided_slice %5 {offsets = [0, 0], sizes = [2, 128], strides = [1, 1]} : vector<2x512xf32> to vector<2x128xf32>
    %20 = arith.addf %18, %19 : vector<2x128xf32>
    %21 = vector.extract_strided_slice %7 {offsets = [0, 128], sizes = [2, 128], strides = [1, 1]} : vector<2x256xf32> to vector<2x128xf32>
    %22 = arith.addf %20, %21 : vector<2x128xf32>
    %23 = vector.extract_strided_slice %9 {offsets = [0, 0], sizes = [2, 128], strides = [1, 1]} : vector<2x256xf32> to vector<2x128xf32>
    %24 = arith.addf %22, %23 : vector<2x128xf32>
    %c0_16 = arith.constant 0 : index
    %c128 = arith.constant 128 : index
    %25 = vector.load %arg7[%c0_16, %c128] : memref<2x512xf32, #tpu.memory_space<vmem>>, vector<2x128xf32>
    tpu.vector_store %arg7[%c0_16, %c128], %24 {strides = array<i32>} : memref<2x512xf32, #tpu.memory_space<vmem>>, vector<2x128xf32>,
    %26 = vector.extract_strided_slice %3 {offsets = [0, 256], sizes = [2, 128], strides = [1, 1]} : vector<2x512xf32> to vector<2x128xf32>
    %27 = vector.extract_strided_slice %5 {offsets = [0, 384], sizes = [2, 128], strides = [1, 1]} : vector<2x512xf32> to vector<2x128xf32>
    %28 = arith.subf %26, %27 : vector<2x128xf32>
    %c0_17 = arith.constant 0 : index
    %c256 = arith.constant 256 : index
    %29 = vector.load %arg7[%c0_17, %c256] : memref<2x512xf32, #tpu.memory_space<vmem>>, vector<2x128xf32>
    tpu.vector_store %arg7[%c0_17, %c256], %28 {strides = array<i32>} : memref<2x512xf32, #tpu.memory_space<vmem>>, vector<2x128xf32>,
    %30 = vector.extract_strided_slice %3 {offsets = [0, 384], sizes = [2, 128], strides = [1, 1]} : vector<2x512xf32> to vector<2x128xf32>
    %31 = vector.extract_strided_slice %5 {offsets = [0, 256], sizes = [2, 128], strides = [1, 1]} : vector<2x512xf32> to vector<2x128xf32>
    %32 = arith.addf %30, %31 : vector<2x128xf32>
    %c0_18 = arith.constant 0 : index
    %c384 = arith.constant 384 : index
    %33 = vector.load %arg7[%c0_18, %c384] : memref<2x512xf32, #tpu.memory_space<vmem>>, vector<2x128xf32>
    tpu.vector_store %arg7[%c0_18, %c384], %32 {strides = array<i32>} : memref<2x512xf32, #tpu.memory_space<vmem>>, vector<2x128xf32>,
    return
  }
  func.func @transform_0(%arg0: i32) -> (i32, i32) {
    %c0_i32 = arith.constant 0 : i32
    %c0_i32_0 = arith.constant 0 : i32
    return %arg0, %c0_i32 : i32, i32
  }
  func.func @transform_1(%arg0: i32) -> (i32, i32) {
    %c0_i32 = arith.constant 0 : i32
    %c0_i32_0 = arith.constant 0 : i32
    return %arg0, %c0_i32 : i32, i32
  }
  func.func @transform_2(%arg0: i32) -> (i32, i32) {
    %c0_i32 = arith.constant 0 : i32
    %c0_i32_0 = arith.constant 0 : i32
    return %arg0, %c0_i32 : i32, i32
  }
  func.func @transform_3(%arg0: i32) -> (i32, i32) {
    %c0_i32 = arith.constant 0 : i32
    %c0_i32_0 = arith.constant 0 : i32
    return %arg0, %c0_i32 : i32, i32
  }
  func.func @transform_4(%arg0: i32) -> (i32, i32) {
    %c0_i32 = arith.constant 0 : i32
    %c0_i32_0 = arith.constant 0 : i32
    %c0_i32_1 = arith.constant 0 : i32
    return %c0_i32, %c0_i32_0 : i32, i32
  }
  func.func @transform_5(%arg0: i32) -> (i32, i32) {
    %c0_i32 = arith.constant 0 : i32
    %c0_i32_0 = arith.constant 0 : i32
    %c0_i32_1 = arith.constant 0 : i32
    return %c0_i32, %c0_i32_0 : i32, i32
  }
  func.func @transform_6(%arg0: i32) -> (i32, i32) {
    %c0_i32 = arith.constant 0 : i32
    %c0_i32_0 = arith.constant 0 : i32
    return %arg0, %c0_i32 : i32, i32
  }
}

module attributes {stable_mosaic.version = 11 : i64} {
  func.func @_matmul_kernel(%arg0: i32, %arg1: memref<2x96xf32, #tpu.memory_space<vmem>>, %arg2: memref<96x96xf32, #tpu.memory_space<vmem>>, %arg3: memref<2x96xf32, #tpu.memory_space<vmem>>) attributes {dimension_semantics = [#tpu.dimension_semantics<parallel>], iteration_bounds = array<i64: 1>, scalar_prefetch = 0 : i64, scratch_operands = 0 : i64, tpu.core_type = #tpu.core_type<tc>, window_params = [{transform_indices = @transform_0, window_bounds = array<i64: 2, 96>}, {pipeline_mode = #tpu.pipeline_mode<synchronous>, transform_indices = @transform_1, window_bounds = array<i64: 96, 96>}, {transform_indices = @transform_2, window_bounds = array<i64: 2, 96>}]} {
    %c0 = arith.constant 0 : index
    %c0_0 = arith.constant 0 : index
    %0 = vector.load %arg1[%c0, %c0_0] : memref<2x96xf32, #tpu.memory_space<vmem>>, vector<2x96xf32>
    %c0_1 = arith.constant 0 : index
    %c0_2 = arith.constant 0 : index
    %1 = vector.load %arg2[%c0_1, %c0_2] : memref<96x96xf32, #tpu.memory_space<vmem>>, vector<96x96xf32>
    %cst = arith.constant dense<0.000000e+00> : vector<2x96xf32>
    %2 = tpu.matmul %0, %1, %cst {dimension_numbers = #tpu.dot_dimension_numbers<[1], [0], [0], [1], [0, 0, 1, 1], [], []>} : vector<2x96xf32>, vector<96x96xf32>, vector<2x96xf32> -> vector<2x96xf32>
    %c0_3 = arith.constant 0 : index
    %c0_4 = arith.constant 0 : index
    %3 = vector.load %arg3[%c0_3, %c0_4] : memref<2x96xf32, #tpu.memory_space<vmem>>, vector<2x96xf32>
    tpu.vector_store %arg3[%c0_3, %c0_4], %2 {strides = array<i32>} : memref<2x96xf32, #tpu.memory_space<vmem>>, vector<2x96xf32>,
    return
  }
  func.func @transform_0(%arg0: i32) -> (i32, i32) {
    %c0_i32 = arith.constant 0 : i32
    %c0_i32_0 = arith.constant 0 : i32
    return %arg0, %c0_i32 : i32, i32
  }
  func.func @transform_1(%arg0: i32) -> (i32, i32) {
    %c0_i32 = arith.constant 0 : i32
    %c0_i32_0 = arith.constant 0 : i32
    %c0_i32_1 = arith.constant 0 : i32
    return %c0_i32, %c0_i32_0 : i32, i32
  }
  func.func @transform_2(%arg0: i32) -> (i32, i32) {
    %c0_i32 = arith.constant 0 : i32
    %c0_i32_0 = arith.constant 0 : i32
    return %arg0, %c0_i32 : i32, i32
  }
}

module attributes {stable_mosaic.version = 11 : i64} {
  func.func @_matmul_kernel(%arg0: i32, %arg1: memref<2x48xf32, #tpu.memory_space<vmem>>, %arg2: memref<48x48xf32, #tpu.memory_space<vmem>>, %arg3: memref<2x48xf32, #tpu.memory_space<vmem>>) attributes {dimension_semantics = [#tpu.dimension_semantics<parallel>], iteration_bounds = array<i64: 1>, scalar_prefetch = 0 : i64, scratch_operands = 0 : i64, tpu.core_type = #tpu.core_type<tc>, window_params = [{transform_indices = @transform_0, window_bounds = array<i64: 2, 48>}, {pipeline_mode = #tpu.pipeline_mode<synchronous>, transform_indices = @transform_1, window_bounds = array<i64: 48, 48>}, {transform_indices = @transform_2, window_bounds = array<i64: 2, 48>}]} {
    %c0 = arith.constant 0 : index
    %c0_0 = arith.constant 0 : index
    %0 = vector.load %arg1[%c0, %c0_0] : memref<2x48xf32, #tpu.memory_space<vmem>>, vector<2x48xf32>
    %c0_1 = arith.constant 0 : index
    %c0_2 = arith.constant 0 : index
    %1 = vector.load %arg2[%c0_1, %c0_2] : memref<48x48xf32, #tpu.memory_space<vmem>>, vector<48x48xf32>
    %cst = arith.constant dense<0.000000e+00> : vector<2x48xf32>
    %2 = tpu.matmul %0, %1, %cst {dimension_numbers = #tpu.dot_dimension_numbers<[1], [0], [0], [1], [0, 0, 1, 1], [], []>} : vector<2x48xf32>, vector<48x48xf32>, vector<2x48xf32> -> vector<2x48xf32>
    %c0_3 = arith.constant 0 : index
    %c0_4 = arith.constant 0 : index
    %3 = vector.load %arg3[%c0_3, %c0_4] : memref<2x48xf32, #tpu.memory_space<vmem>>, vector<2x48xf32>
    tpu.vector_store %arg3[%c0_3, %c0_4], %2 {strides = array<i32>} : memref<2x48xf32, #tpu.memory_space<vmem>>, vector<2x48xf32>,
    return
  }
  func.func @transform_0(%arg0: i32) -> (i32, i32) {
    %c0_i32 = arith.constant 0 : i32
    %c0_i32_0 = arith.constant 0 : i32
    return %arg0, %c0_i32 : i32, i32
  }
  func.func @transform_1(%arg0: i32) -> (i32, i32) {
    %c0_i32 = arith.constant 0 : i32
    %c0_i32_0 = arith.constant 0 : i32
    %c0_i32_1 = arith.constant 0 : i32
    return %c0_i32, %c0_i32_0 : i32, i32
  }
  func.func @transform_2(%arg0: i32) -> (i32, i32) {
    %c0_i32 = arith.constant 0 : i32
    %c0_i32_0 = arith.constant 0 : i32
    return %arg0, %c0_i32 : i32, i32
  }
}

module attributes {stable_mosaic.version = 11 : i64} {
  func.func @_matmul_kernel(%arg0: i32, %arg1: memref<2x24xf32, #tpu.memory_space<vmem>>, %arg2: memref<24x24xf32, #tpu.memory_space<vmem>>, %arg3: memref<2x24xf32, #tpu.memory_space<vmem>>) attributes {dimension_semantics = [#tpu.dimension_semantics<parallel>], iteration_bounds = array<i64: 1>, scalar_prefetch = 0 : i64, scratch_operands = 0 : i64, tpu.core_type = #tpu.core_type<tc>, window_params = [{transform_indices = @transform_0, window_bounds = array<i64: 2, 24>}, {pipeline_mode = #tpu.pipeline_mode<synchronous>, transform_indices = @transform_1, window_bounds = array<i64: 24, 24>}, {transform_indices = @transform_2, window_bounds = array<i64: 2, 24>}]} {
    %c0 = arith.constant 0 : index
    %c0_0 = arith.constant 0 : index
    %0 = vector.load %arg1[%c0, %c0_0] : memref<2x24xf32, #tpu.memory_space<vmem>>, vector<2x24xf32>
    %c0_1 = arith.constant 0 : index
    %c0_2 = arith.constant 0 : index
    %1 = vector.load %arg2[%c0_1, %c0_2] : memref<24x24xf32, #tpu.memory_space<vmem>>, vector<24x24xf32>
    %cst = arith.constant dense<0.000000e+00> : vector<2x24xf32>
    %2 = tpu.matmul %0, %1, %cst {dimension_numbers = #tpu.dot_dimension_numbers<[1], [0], [0], [1], [0, 0, 1, 1], [], []>} : vector<2x24xf32>, vector<24x24xf32>, vector<2x24xf32> -> vector<2x24xf32>
    %c0_3 = arith.constant 0 : index
    %c0_4 = arith.constant 0 : index
    %3 = vector.load %arg3[%c0_3, %c0_4] : memref<2x24xf32, #tpu.memory_space<vmem>>, vector<2x24xf32>
    tpu.vector_store %arg3[%c0_3, %c0_4], %2 {strides = array<i32>} : memref<2x24xf32, #tpu.memory_space<vmem>>, vector<2x24xf32>,
    return
  }
  func.func @transform_0(%arg0: i32) -> (i32, i32) {
    %c0_i32 = arith.constant 0 : i32
    %c0_i32_0 = arith.constant 0 : i32
    return %arg0, %c0_i32 : i32, i32
  }
  func.func @transform_1(%arg0: i32) -> (i32, i32) {
    %c0_i32 = arith.constant 0 : i32
    %c0_i32_0 = arith.constant 0 : i32
    %c0_i32_1 = arith.constant 0 : i32
    return %c0_i32, %c0_i32_0 : i32, i32
  }
  func.func @transform_2(%arg0: i32) -> (i32, i32) {
    %c0_i32 = arith.constant 0 : i32
    %c0_i32_0 = arith.constant 0 : i32
    return %arg0, %c0_i32 : i32, i32
  }
}

module attributes {stable_mosaic.version = 11 : i64} {
  func.func @_t0_kernel(%arg0: i32, %arg1: memref<2x12xf32, #tpu.memory_space<vmem>>, %arg2: memref<12x12xf32, #tpu.memory_space<vmem>>, %arg3: memref<1x12xf32, #tpu.memory_space<vmem>>, %arg4: memref<2x12xf32, #tpu.memory_space<vmem>>) attributes {dimension_semantics = [#tpu.dimension_semantics<parallel>], iteration_bounds = array<i64: 1>, scalar_prefetch = 0 : i64, scratch_operands = 0 : i64, tpu.core_type = #tpu.core_type<tc>, window_params = [{transform_indices = @transform_0, window_bounds = array<i64: 2, 12>}, {pipeline_mode = #tpu.pipeline_mode<synchronous>, transform_indices = @transform_1, window_bounds = array<i64: 12, 12>}, {pipeline_mode = #tpu.pipeline_mode<synchronous>, transform_indices = @transform_2, window_bounds = array<i64: 1, 12>}, {transform_indices = @transform_3, window_bounds = array<i64: 2, 12>}]} {
    %c0 = arith.constant 0 : index
    %c0_0 = arith.constant 0 : index
    %0 = vector.load %arg1[%c0, %c0_0] : memref<2x12xf32, #tpu.memory_space<vmem>>, vector<2x12xf32>
    %c0_1 = arith.constant 0 : index
    %c0_2 = arith.constant 0 : index
    %1 = vector.load %arg2[%c0_1, %c0_2] : memref<12x12xf32, #tpu.memory_space<vmem>>, vector<12x12xf32>
    %cst = arith.constant dense<0.000000e+00> : vector<2x12xf32>
    %2 = tpu.matmul %0, %1, %cst {dimension_numbers = #tpu.dot_dimension_numbers<[1], [0], [0], [1], [0, 0, 1, 1], [], []>} : vector<2x12xf32>, vector<12x12xf32>, vector<2x12xf32> -> vector<2x12xf32>
    %c0_3 = arith.constant 0 : index
    %c0_4 = arith.constant 0 : index
    %3 = vector.load %arg3[%c0_3, %c0_4] : memref<1x12xf32, #tpu.memory_space<vmem>>, vector<1x12xf32>
    %4 = vector.broadcast %3 : vector<1x12xf32> to vector<2x12xf32>
    %5 = arith.addf %2, %4 : vector<2x12xf32>
    %c0_5 = arith.constant 0 : index
    %c0_6 = arith.constant 0 : index
    %6 = vector.load %arg4[%c0_5, %c0_6] : memref<2x12xf32, #tpu.memory_space<vmem>>, vector<2x12xf32>
    tpu.vector_store %arg4[%c0_5, %c0_6], %5 {strides = array<i32>} : memref<2x12xf32, #tpu.memory_space<vmem>>, vector<2x12xf32>,
    return
  }
  func.func @transform_0(%arg0: i32) -> (i32, i32) {
    %c0_i32 = arith.constant 0 : i32
    %c0_i32_0 = arith.constant 0 : i32
    return %arg0, %c0_i32 : i32, i32
  }
  func.func @transform_1(%arg0: i32) -> (i32, i32) {
    %c0_i32 = arith.constant 0 : i32
    %c0_i32_0 = arith.constant 0 : i32
    %c0_i32_1 = arith.constant 0 : i32
    return %c0_i32, %c0_i32_0 : i32, i32
  }
  func.func @transform_2(%arg0: i32) -> (i32, i32) {
    %c0_i32 = arith.constant 0 : i32
    %c0_i32_0 = arith.constant 0 : i32
    %c0_i32_1 = arith.constant 0 : i32
    return %c0_i32, %c0_i32_0 : i32, i32
  }
  func.func @transform_3(%arg0: i32) -> (i32, i32) {
    %c0_i32 = arith.constant 0 : i32
    %c0_i32_0 = arith.constant 0 : i32
    return %arg0, %c0_i32 : i32, i32
  }
}

module attributes {stable_mosaic.version = 11 : i64} {
  func.func @_rec_kernel(%arg0: i32, %arg1: memref<2x24xf32, #tpu.memory_space<vmem>>, %arg2: memref<2x48xf32, #tpu.memory_space<vmem>>, %arg3: memref<24x48xf32, #tpu.memory_space<vmem>>, %arg4: memref<48x48xf32, #tpu.memory_space<vmem>>, %arg5: memref<2x48xf32, #tpu.memory_space<vmem>>) attributes {dimension_semantics = [#tpu.dimension_semantics<parallel>], iteration_bounds = array<i64: 1>, scalar_prefetch = 0 : i64, scratch_operands = 0 : i64, tpu.core_type = #tpu.core_type<tc>, window_params = [{transform_indices = @transform_0, window_bounds = array<i64: 2, 24>}, {transform_indices = @transform_1, window_bounds = array<i64: 2, 48>}, {pipeline_mode = #tpu.pipeline_mode<synchronous>, transform_indices = @transform_2, window_bounds = array<i64: 24, 48>}, {pipeline_mode = #tpu.pipeline_mode<synchronous>, transform_indices = @transform_3, window_bounds = array<i64: 48, 48>}, {transform_indices = @transform_4, window_bounds = array<i64: 2, 48>}]} {
    %c0 = arith.constant 0 : index
    %c0_0 = arith.constant 0 : index
    %0 = vector.load %arg1[%c0, %c0_0] : memref<2x24xf32, #tpu.memory_space<vmem>>, vector<2x24xf32>
    %c0_1 = arith.constant 0 : index
    %c0_2 = arith.constant 0 : index
    %1 = vector.load %arg3[%c0_1, %c0_2] : memref<24x48xf32, #tpu.memory_space<vmem>>, vector<24x48xf32>
    %cst = arith.constant dense<0.000000e+00> : vector<2x48xf32>
    %2 = tpu.matmul %0, %1, %cst {dimension_numbers = #tpu.dot_dimension_numbers<[1], [0], [0], [1], [0, 0, 1, 1], [], []>} : vector<2x24xf32>, vector<24x48xf32>, vector<2x48xf32> -> vector<2x48xf32>
    %c0_3 = arith.constant 0 : index
    %c0_4 = arith.constant 0 : index
    %3 = vector.load %arg2[%c0_3, %c0_4] : memref<2x48xf32, #tpu.memory_space<vmem>>, vector<2x48xf32>
    %c0_5 = arith.constant 0 : index
    %c0_6 = arith.constant 0 : index
    %4 = vector.load %arg4[%c0_5, %c0_6] : memref<48x48xf32, #tpu.memory_space<vmem>>, vector<48x48xf32>
    %cst_7 = arith.constant dense<0.000000e+00> : vector<2x48xf32>
    %5 = tpu.matmul %3, %4, %cst_7 {dimension_numbers = #tpu.dot_dimension_numbers<[1], [0], [0], [1], [0, 0, 1, 1], [], []>} : vector<2x48xf32>, vector<48x48xf32>, vector<2x48xf32> -> vector<2x48xf32>
    %6 = arith.addf %2, %5 : vector<2x48xf32>
    %c0_8 = arith.constant 0 : index
    %c0_9 = arith.constant 0 : index
    %7 = vector.load %arg5[%c0_8, %c0_9] : memref<2x48xf32, #tpu.memory_space<vmem>>, vector<2x48xf32>
    tpu.vector_store %arg5[%c0_8, %c0_9], %6 {strides = array<i32>} : memref<2x48xf32, #tpu.memory_space<vmem>>, vector<2x48xf32>,
    return
  }
  func.func @transform_0(%arg0: i32) -> (i32, i32) {
    %c0_i32 = arith.constant 0 : i32
    %c0_i32_0 = arith.constant 0 : i32
    return %arg0, %c0_i32 : i32, i32
  }
  func.func @transform_1(%arg0: i32) -> (i32, i32) {
    %c0_i32 = arith.constant 0 : i32
    %c0_i32_0 = arith.constant 0 : i32
    return %arg0, %c0_i32 : i32, i32
  }
  func.func @transform_2(%arg0: i32) -> (i32, i32) {
    %c0_i32 = arith.constant 0 : i32
    %c0_i32_0 = arith.constant 0 : i32
    %c0_i32_1 = arith.constant 0 : i32
    return %c0_i32, %c0_i32_0 : i32, i32
  }
  func.func @transform_3(%arg0: i32) -> (i32, i32) {
    %c0_i32 = arith.constant 0 : i32
    %c0_i32_0 = arith.constant 0 : i32
    %c0_i32_1 = arith.constant 0 : i32
    return %c0_i32, %c0_i32_0 : i32, i32
  }
  func.func @transform_4(%arg0: i32) -> (i32, i32) {
    %c0_i32 = arith.constant 0 : i32
    %c0_i32_0 = arith.constant 0 : i32
    return %arg0, %c0_i32 : i32, i32
  }
}

module attributes {stable_mosaic.version = 11 : i64} {
  func.func @_rec_kernel(%arg0: i32, %arg1: memref<2x12xf32, #tpu.memory_space<vmem>>, %arg2: memref<2x24xf32, #tpu.memory_space<vmem>>, %arg3: memref<12x24xf32, #tpu.memory_space<vmem>>, %arg4: memref<24x24xf32, #tpu.memory_space<vmem>>, %arg5: memref<2x24xf32, #tpu.memory_space<vmem>>) attributes {dimension_semantics = [#tpu.dimension_semantics<parallel>], iteration_bounds = array<i64: 1>, scalar_prefetch = 0 : i64, scratch_operands = 0 : i64, tpu.core_type = #tpu.core_type<tc>, window_params = [{transform_indices = @transform_0, window_bounds = array<i64: 2, 12>}, {transform_indices = @transform_1, window_bounds = array<i64: 2, 24>}, {pipeline_mode = #tpu.pipeline_mode<synchronous>, transform_indices = @transform_2, window_bounds = array<i64: 12, 24>}, {pipeline_mode = #tpu.pipeline_mode<synchronous>, transform_indices = @transform_3, window_bounds = array<i64: 24, 24>}, {transform_indices = @transform_4, window_bounds = array<i64: 2, 24>}]} {
    %c0 = arith.constant 0 : index
    %c0_0 = arith.constant 0 : index
    %0 = vector.load %arg1[%c0, %c0_0] : memref<2x12xf32, #tpu.memory_space<vmem>>, vector<2x12xf32>
    %c0_1 = arith.constant 0 : index
    %c0_2 = arith.constant 0 : index
    %1 = vector.load %arg3[%c0_1, %c0_2] : memref<12x24xf32, #tpu.memory_space<vmem>>, vector<12x24xf32>
    %cst = arith.constant dense<0.000000e+00> : vector<2x24xf32>
    %2 = tpu.matmul %0, %1, %cst {dimension_numbers = #tpu.dot_dimension_numbers<[1], [0], [0], [1], [0, 0, 1, 1], [], []>} : vector<2x12xf32>, vector<12x24xf32>, vector<2x24xf32> -> vector<2x24xf32>
    %c0_3 = arith.constant 0 : index
    %c0_4 = arith.constant 0 : index
    %3 = vector.load %arg2[%c0_3, %c0_4] : memref<2x24xf32, #tpu.memory_space<vmem>>, vector<2x24xf32>
    %c0_5 = arith.constant 0 : index
    %c0_6 = arith.constant 0 : index
    %4 = vector.load %arg4[%c0_5, %c0_6] : memref<24x24xf32, #tpu.memory_space<vmem>>, vector<24x24xf32>
    %cst_7 = arith.constant dense<0.000000e+00> : vector<2x24xf32>
    %5 = tpu.matmul %3, %4, %cst_7 {dimension_numbers = #tpu.dot_dimension_numbers<[1], [0], [0], [1], [0, 0, 1, 1], [], []>} : vector<2x24xf32>, vector<24x24xf32>, vector<2x24xf32> -> vector<2x24xf32>
    %6 = arith.addf %2, %5 : vector<2x24xf32>
    %c0_8 = arith.constant 0 : index
    %c0_9 = arith.constant 0 : index
    %7 = vector.load %arg5[%c0_8, %c0_9] : memref<2x24xf32, #tpu.memory_space<vmem>>, vector<2x24xf32>
    tpu.vector_store %arg5[%c0_8, %c0_9], %6 {strides = array<i32>} : memref<2x24xf32, #tpu.memory_space<vmem>>, vector<2x24xf32>,
    return
  }
  func.func @transform_0(%arg0: i32) -> (i32, i32) {
    %c0_i32 = arith.constant 0 : i32
    %c0_i32_0 = arith.constant 0 : i32
    return %arg0, %c0_i32 : i32, i32
  }
  func.func @transform_1(%arg0: i32) -> (i32, i32) {
    %c0_i32 = arith.constant 0 : i32
    %c0_i32_0 = arith.constant 0 : i32
    return %arg0, %c0_i32 : i32, i32
  }
  func.func @transform_2(%arg0: i32) -> (i32, i32) {
    %c0_i32 = arith.constant 0 : i32
    %c0_i32_0 = arith.constant 0 : i32
    %c0_i32_1 = arith.constant 0 : i32
    return %c0_i32, %c0_i32_0 : i32, i32
  }
  func.func @transform_3(%arg0: i32) -> (i32, i32) {
    %c0_i32 = arith.constant 0 : i32
    %c0_i32_0 = arith.constant 0 : i32
    %c0_i32_1 = arith.constant 0 : i32
    return %c0_i32, %c0_i32_0 : i32, i32
  }
  func.func @transform_4(%arg0: i32) -> (i32, i32) {
    %c0_i32 = arith.constant 0 : i32
    %c0_i32_0 = arith.constant 0 : i32
    return %arg0, %c0_i32 : i32, i32
  }
}

module attributes {stable_mosaic.version = 11 : i64} {
  func.func @_rec_kernel(%arg0: i32, %arg1: memref<2x48xf32, #tpu.memory_space<vmem>>, %arg2: memref<2x96xf32, #tpu.memory_space<vmem>>, %arg3: memref<48x96xf32, #tpu.memory_space<vmem>>, %arg4: memref<96x96xf32, #tpu.memory_space<vmem>>, %arg5: memref<2x96xf32, #tpu.memory_space<vmem>>) attributes {dimension_semantics = [#tpu.dimension_semantics<parallel>], iteration_bounds = array<i64: 1>, scalar_prefetch = 0 : i64, scratch_operands = 0 : i64, tpu.core_type = #tpu.core_type<tc>, window_params = [{transform_indices = @transform_0, window_bounds = array<i64: 2, 48>}, {transform_indices = @transform_1, window_bounds = array<i64: 2, 96>}, {pipeline_mode = #tpu.pipeline_mode<synchronous>, transform_indices = @transform_2, window_bounds = array<i64: 48, 96>}, {pipeline_mode = #tpu.pipeline_mode<synchronous>, transform_indices = @transform_3, window_bounds = array<i64: 96, 96>}, {transform_indices = @transform_4, window_bounds = array<i64: 2, 96>}]} {
    %c0 = arith.constant 0 : index
    %c0_0 = arith.constant 0 : index
    %0 = vector.load %arg1[%c0, %c0_0] : memref<2x48xf32, #tpu.memory_space<vmem>>, vector<2x48xf32>
    %c0_1 = arith.constant 0 : index
    %c0_2 = arith.constant 0 : index
    %1 = vector.load %arg3[%c0_1, %c0_2] : memref<48x96xf32, #tpu.memory_space<vmem>>, vector<48x96xf32>
    %cst = arith.constant dense<0.000000e+00> : vector<2x96xf32>
    %2 = tpu.matmul %0, %1, %cst {dimension_numbers = #tpu.dot_dimension_numbers<[1], [0], [0], [1], [0, 0, 1, 1], [], []>} : vector<2x48xf32>, vector<48x96xf32>, vector<2x96xf32> -> vector<2x96xf32>
    %c0_3 = arith.constant 0 : index
    %c0_4 = arith.constant 0 : index
    %3 = vector.load %arg2[%c0_3, %c0_4] : memref<2x96xf32, #tpu.memory_space<vmem>>, vector<2x96xf32>
    %c0_5 = arith.constant 0 : index
    %c0_6 = arith.constant 0 : index
    %4 = vector.load %arg4[%c0_5, %c0_6] : memref<96x96xf32, #tpu.memory_space<vmem>>, vector<96x96xf32>
    %cst_7 = arith.constant dense<0.000000e+00> : vector<2x96xf32>
    %5 = tpu.matmul %3, %4, %cst_7 {dimension_numbers = #tpu.dot_dimension_numbers<[1], [0], [0], [1], [0, 0, 1, 1], [], []>} : vector<2x96xf32>, vector<96x96xf32>, vector<2x96xf32> -> vector<2x96xf32>
    %6 = arith.addf %2, %5 : vector<2x96xf32>
    %c0_8 = arith.constant 0 : index
    %c0_9 = arith.constant 0 : index
    %7 = vector.load %arg5[%c0_8, %c0_9] : memref<2x96xf32, #tpu.memory_space<vmem>>, vector<2x96xf32>
    tpu.vector_store %arg5[%c0_8, %c0_9], %6 {strides = array<i32>} : memref<2x96xf32, #tpu.memory_space<vmem>>, vector<2x96xf32>,
    return
  }
  func.func @transform_0(%arg0: i32) -> (i32, i32) {
    %c0_i32 = arith.constant 0 : i32
    %c0_i32_0 = arith.constant 0 : i32
    return %arg0, %c0_i32 : i32, i32
  }
  func.func @transform_1(%arg0: i32) -> (i32, i32) {
    %c0_i32 = arith.constant 0 : i32
    %c0_i32_0 = arith.constant 0 : i32
    return %arg0, %c0_i32 : i32, i32
  }
  func.func @transform_2(%arg0: i32) -> (i32, i32) {
    %c0_i32 = arith.constant 0 : i32
    %c0_i32_0 = arith.constant 0 : i32
    %c0_i32_1 = arith.constant 0 : i32
    return %c0_i32, %c0_i32_0 : i32, i32
  }
  func.func @transform_3(%arg0: i32) -> (i32, i32) {
    %c0_i32 = arith.constant 0 : i32
    %c0_i32_0 = arith.constant 0 : i32
    %c0_i32_1 = arith.constant 0 : i32
    return %c0_i32, %c0_i32_0 : i32, i32
  }
  func.func @transform_4(%arg0: i32) -> (i32, i32) {
    %c0_i32 = arith.constant 0 : i32
    %c0_i32_0 = arith.constant 0 : i32
    return %arg0, %c0_i32 : i32, i32
  }
}

module attributes {stable_mosaic.version = 11 : i64} {
  func.func @_rec_kernel(%arg0: i32, %arg1: memref<2x96xf32, #tpu.memory_space<vmem>>, %arg2: memref<2x192xf32, #tpu.memory_space<vmem>>, %arg3: memref<96x192xf32, #tpu.memory_space<vmem>>, %arg4: memref<192x192xf32, #tpu.memory_space<vmem>>, %arg5: memref<2x192xf32, #tpu.memory_space<vmem>>) attributes {dimension_semantics = [#tpu.dimension_semantics<parallel>], iteration_bounds = array<i64: 1>, scalar_prefetch = 0 : i64, scratch_operands = 0 : i64, tpu.core_type = #tpu.core_type<tc>, window_params = [{transform_indices = @transform_0, window_bounds = array<i64: 2, 96>}, {transform_indices = @transform_1, window_bounds = array<i64: 2, 192>}, {pipeline_mode = #tpu.pipeline_mode<synchronous>, transform_indices = @transform_2, window_bounds = array<i64: 96, 192>}, {pipeline_mode = #tpu.pipeline_mode<synchronous>, transform_indices = @transform_3, window_bounds = array<i64: 192, 192>}, {transform_indices = @transform_4, window_bounds = array<i64: 2, 192>}]} {
    %c0 = arith.constant 0 : index
    %c0_0 = arith.constant 0 : index
    %0 = vector.load %arg1[%c0, %c0_0] : memref<2x96xf32, #tpu.memory_space<vmem>>, vector<2x96xf32>
    %c0_1 = arith.constant 0 : index
    %c0_2 = arith.constant 0 : index
    %1 = vector.load %arg3[%c0_1, %c0_2] : memref<96x192xf32, #tpu.memory_space<vmem>>, vector<96x192xf32>
    %cst = arith.constant dense<0.000000e+00> : vector<2x192xf32>
    %2 = tpu.matmul %0, %1, %cst {dimension_numbers = #tpu.dot_dimension_numbers<[1], [0], [0], [1], [0, 0, 1, 1], [], []>} : vector<2x96xf32>, vector<96x192xf32>, vector<2x192xf32> -> vector<2x192xf32>
    %c0_3 = arith.constant 0 : index
    %c0_4 = arith.constant 0 : index
    %3 = vector.load %arg2[%c0_3, %c0_4] : memref<2x192xf32, #tpu.memory_space<vmem>>, vector<2x192xf32>
    %c0_5 = arith.constant 0 : index
    %c0_6 = arith.constant 0 : index
    %4 = vector.load %arg4[%c0_5, %c0_6] : memref<192x192xf32, #tpu.memory_space<vmem>>, vector<192x192xf32>
    %cst_7 = arith.constant dense<0.000000e+00> : vector<2x192xf32>
    %5 = tpu.matmul %3, %4, %cst_7 {dimension_numbers = #tpu.dot_dimension_numbers<[1], [0], [0], [1], [0, 0, 1, 1], [], []>} : vector<2x192xf32>, vector<192x192xf32>, vector<2x192xf32> -> vector<2x192xf32>
    %6 = arith.addf %2, %5 : vector<2x192xf32>
    %c0_8 = arith.constant 0 : index
    %c0_9 = arith.constant 0 : index
    %7 = vector.load %arg5[%c0_8, %c0_9] : memref<2x192xf32, #tpu.memory_space<vmem>>, vector<2x192xf32>
    tpu.vector_store %arg5[%c0_8, %c0_9], %6 {strides = array<i32>} : memref<2x192xf32, #tpu.memory_space<vmem>>, vector<2x192xf32>,
    return
  }
  func.func @transform_0(%arg0: i32) -> (i32, i32) {
    %c0_i32 = arith.constant 0 : i32
    %c0_i32_0 = arith.constant 0 : i32
    return %arg0, %c0_i32 : i32, i32
  }
  func.func @transform_1(%arg0: i32) -> (i32, i32) {
    %c0_i32 = arith.constant 0 : i32
    %c0_i32_0 = arith.constant 0 : i32
    return %arg0, %c0_i32 : i32, i32
  }
  func.func @transform_2(%arg0: i32) -> (i32, i32) {
    %c0_i32 = arith.constant 0 : i32
    %c0_i32_0 = arith.constant 0 : i32
    %c0_i32_1 = arith.constant 0 : i32
    return %c0_i32, %c0_i32_0 : i32, i32
  }
  func.func @transform_3(%arg0: i32) -> (i32, i32) {
    %c0_i32 = arith.constant 0 : i32
    %c0_i32_0 = arith.constant 0 : i32
    %c0_i32_1 = arith.constant 0 : i32
    return %c0_i32, %c0_i32_0 : i32, i32
  }
  func.func @transform_4(%arg0: i32) -> (i32, i32) {
    %c0_i32 = arith.constant 0 : i32
    %c0_i32_0 = arith.constant 0 : i32
    return %arg0, %c0_i32 : i32, i32
  }
}

</mosaic_0001>

<bundles_post_ra>
// kernel: reverse.3
= control target key start
LH: loop header
LB: loop body
LE: loop exit
PB: predicated region body
PF: predicated region fallthrough
CT: control target
= control target key end

     0   :  { %v58_v2 = vld [vmem:[#allocation1 + $0x8] sm:$0xf]  ;;  %v65_v3 = vld [vmem:[#allocation1] sm:$0xf]  ;;  %v75_v6 = vlaneseq  ;;  %s185_s0 = inlined_call_operand.vmem [shape: f32[2,24,3], index: 0, kind: input, shape index: {}]   ;;  %s186_s1 = inlined_call_operand.vmem [shape: f32[2,24,3], index: 1, kind: output, shape index: {}]  }
   0x1   :  { %v19_v0 = vld [vmem:[%s185_s0] sm:$0xf]  ;;  %v21_v1 = vld [vmem:[%s185_s0 + $0x4] sm:$0xf]  ;;  %60 = vst [vmem:[#allocation0 + $0x10] sm:$0xf] %v58_v2 }
   0x2   :  { %20 = vst [vmem:[#allocation1 + $0x4] sm:$0xf] %v19_v0  ;;  %22 = vst [vmem:[#allocation1 + $0xc] sm:$0xf] %v21_v1  ;;  %v76_v11 = vshrl.u32 %v75_v6, 7 }
   0x3   :  { %66 = vst [vmem:[#allocation0] sm:$0xf] %v65_v3 }
   0x4   :  { %vm77_vm0 = vcmp.lt.s32.totalorder %v76_v11, 3 }
   0x8   :  { %v82_v7 = vld [vmem:[#allocation0 + $0x17] ss:$-1 sm:$0xff] }
   0x9   :  { %v53_v4 = vld [vmem:[#allocation1 + $0xc] sm:$0xf]  ;;  %v62_v5 = vld [vmem:[#allocation1 + $0x4] sm:$0xf]  ;;  %v83_v9 = vrot.slane %v82_v7, 5 }
   0xa   :  { %55 = vst [vmem:[#allocation0 + $0x18] sm:$0xf] %v53_v4  ;;  %64 = vst [vmem:[#allocation0 + $0x8] sm:$0xf] %v62_v5  ;;  %v68_v8 = vld [vmem:[#allocation0 + $0x7] ss:$-1 sm:$0xff] }
   0xb   :  { %v69_v10 = vrot.slane %v68_v8, 5  ;;  %84 = vst [vmem:[#allocation2 + $0x8] sm:$0xff] %v83_v9 }
   0xd   :  { %70 = vst [vmem:[#allocation2] sm:$0xff] %v69_v10 }
  0x11   :  { %v73_v12 = vld [vmem:[#allocation0 + $0xf] ss:$-1 sm:$0xff]  ;;  %v87_v13 = vld [vmem:[#allocation0 + $0x1f] ss:$-1 sm:$0xff] }
  0x12   :  { %v74_v14 = vrot.slane %v73_v12, 5  ;;  %v88_v15 = vrot.slane %v87_v13, 5 }
  0x14   :  { %78 = vst.msk [vmem:[#allocation2] sm:$0xff] %vm77_vm0, %v74_v14  ;;  %92 = vst.msk [vmem:[#allocation2 + $0x8] sm:$0xff] %vm77_vm0, %v88_v15 }
  0x1b   :  { %v97_v16 = vld [vmem:[#allocation2] sm:$0xf]  ;;  %v102_v17 = vld [vmem:[#allocation2 + $0x8] sm:$0xf] }
  0x1c   :  { %100 = vst [vmem:[#allocation3] sm:$0xf] %v97_v16  ;;  %106 = vst [vmem:[#allocation3 + $0x4] sm:$0xf] %v102_v17 }
  0x23   :  { %v123_v18 = vld [vmem:[#allocation3] sm:$0xff]  }
  0x24   :  { %124 = vst [vmem:[%s186_s1] sm:$0xff] %v123_v18  }

// kernel: mwt_cz1d_forward.13
= control target key start
LH: loop header
LB: loop body
LE: loop exit
PB: predicated region body
PF: predicated region fallthrough
CT: control target
= control target key end

     0   :  { %7 = vsyncpa [#allocation3], 0  ;;  %s206_s9 = smov [#allocation2]   ;;  %s239_s0 = inlined_call_operand.vmem [shape: f32[2,192], index: 0, kind: input, shape index: {}]   ;;  %s240_s1 = inlined_call_operand.hbm [shape: f32[192,192], index: 1, kind: input, shape index: {}]   ;;  %s241_s2 = inlined_call_operand.vmem [shape: f32[2,192], index: 2, kind: output, shape index: {}]  }
   0x1   :  { %s15_s10 = sshll.u32 %s206_s9, 4  ;;  %s16_s10 = int_to_ptr.vmem [resolvable:$true] %s15_s10 }
   0x2   :  { %s192_s11 = scalar_lea.vmem %s16_s10, 6144  ;;  %p197_p1 = scmp.lt.s32.totalorder %s16_s10, %s16_s10 }
   0x3   :  { %p193_p0 = scmp.ne.s32.totalorder %s16_s10, %s192_s11  ;;  %p198_p2 = scmp.lt.s32.totalorder %s192_s11, %s192_s11 }
   0x5   :  { %p199_p3 = por %p198_p2, %p197_p1 }
   0x7   :  { %p200_p4 = pnand %p199_p3, %p193_p0 }
   0x9   :  { %203 = shalt.err (!%p200_p4)
}
   0xa   :  { %s207_s12 = smov 256   ;;  %s208_s13 = smov 16  }
   0xb   :  { %21 = dma.hbm_to_vmem [thread:$0]  %s240_s1, 6144, %s16_s10, [#allocation3], %s207_s12, %s207_s12, %s208_s13  }
   0xc   :  { %204 = dma.done.wait [#allocation3], 6144  }
   0xd   :  { %205 = vsyncadd [#allocation3], 4294961152  ;;  %v57_v0 = vld [vmem:[#allocation2 + $0xf8] sm:$0xff]  ;;  %v56_v1 = vld [vmem:[#allocation2 + $0xf0] sm:$0xff]  ;;  %vm84_vm0 = vcmask 523264   ;;  %v164_v52 = vlaneseq  ;;  %vm169_vm1 = vcmask 1041408  }
   0xe   :  { %v55_v2 = vld [vmem:[#allocation2 + $0xe8] sm:$0xff]  ;;  %87 = vmatprep.subr.mxu0 %v57_v0  ;;  %v54_v3 = vld [vmem:[#allocation2 + $0xe0] sm:$0xff]  ;;  %v53_v4 = vld [vmem:[#allocation2 + $0xd8] sm:$0xff]  ;;  %v209_v50 = vmov 1983009808   ;;  %vm170_vm2 = vcmask 519170  }
   0xf   :  { %88 = vmatpush1.msra.mxu0 %v56_v1  ;;  %v52_v5 = vld [vmem:[#allocation2 + $0xd0] sm:$0xff]  ;;  %v51_v6 = vld [vmem:[#allocation2 + $0xc8] sm:$0xff]  ;;  %v50_v7 = vld [vmem:[#allocation2 + $0xc0] sm:$0xff]  ;;  %v162_v51 = vunpack.c.l.s4 %v209_v50  ;;  %v165_v54 = vshrl.u32 %v164_v52, 7 }
  0x10   :  { %89 = vmatprep.subr.mxu0 %v55_v2  ;;  %v49_v8 = vld [vmem:[#allocation2 + $0xb8] sm:$0xff]  ;;  %v48_v9 = vld [vmem:[#allocation2 + $0xb0] sm:$0xff]  ;;  %v47_v10 = vld [vmem:[#allocation2 + $0xa8] sm:$0xff] }
  0x11   :  { %90 = vmatpush1.msra.mxu0 %v54_v3  ;;  %v46_v11 = vld [vmem:[#allocation2 + $0xa0] sm:$0xff]  ;;  %v45_v12 = vld [vmem:[#allocation2 + $0x98] sm:$0xff]  ;;  %v44_v13 = vld [vmem:[#allocation2 + $0x90] sm:$0xff]  ;;  %v163_v53 = vunpack.c.0.s8 %v162_v51 }
  0x12   :  { %91 = vmatprep.subr.mxu0 %v53_v4  ;;  %v43_v14 = vld [vmem:[#allocation2 + $0x88] sm:$0xff]  ;;  %v42_v15 = vld [vmem:[#allocation2 + $0x80] sm:$0xff]  ;;  %v41_v16 = vld [vmem:[#allocation2 + $0x78] sm:$0xff] }
  0x13   :  { %92 = vmatpush1.msra.mxu0 %v52_v5  ;;  %v40_v17 = vld [vmem:[#allocation2 + $0x70] sm:$0xff]  ;;  %v39_v18 = vld [vmem:[#allocation2 + $0x68] sm:$0xff]  ;;  %v231_v19 = vld.sshfl [vmem:[%s239_s0] sm:$0x33 pattern:$0x76325410]  ;;  %v166_v56 = vsub.s32 %v163_v53, %v165_v54 }
  0x14   :  { %93 = vmatprep.subr.mxu0 %v51_v6  ;;  %v38_v20 = vld [vmem:[#allocation2 + $0x60] sm:$0xff]  ;;  %v82_v21 = vcombine.high %v231_v19, %v231_v19  ;;  %v37_v22 = vld [vmem:[#allocation2 + $0x58] sm:$0xff]  ;;  %v36_v23 = vld [vmem:[#allocation2 + $0x50] sm:$0xff] }
  0x15   :  { %94 = vmatpush1.msra.mxu0 %v50_v7  ;;  %v35_v24 = vld [vmem:[#allocation2 + $0x48] sm:$0xff]  ;;  %v34_v25 = vld [vmem:[#allocation2 + $0x40] sm:$0xff]  ;;  %v33_v26 = vld [vmem:[#allocation2 + $0x38] sm:$0xff] }
  0x16   :  { %95 = vmatprep.subr.mxu0 %v49_v8  ;;  %179 = vmatprep.mubr.msk.f32.mxu0 %vm84_vm0, %v82_v21  ;;  %v32_v27 = vld [vmem:[#allocation2 + $0x30] sm:$0xff]  ;;  %v31_v28 = vld [vmem:[#allocation2 + $0x28] sm:$0xff]  ;;  %v30_v29 = vld [vmem:[#allocation2 + $0x20] sm:$0xff] }
  0x17   :  { %96 = vmatpush1.msra.mxu0 %v48_v9  ;;  %v29_v30 = vld [vmem:[#allocation2 + $0x18] sm:$0xff]  ;;  %v28_v31 = vld [vmem:[#allocation2 + $0x10] sm:$0xff]  ;;  %v27_v32 = vld [vmem:[#allocation2 + $0x8] sm:$0xff] }
  0x18   :  { %97 = vmatprep.subr.mxu0 %v47_v10  ;;  %v26_v33 = vld [vmem:[#allocation2] sm:$0xff]  ;;  %v73_v34 = vld [vmem:[#allocation2 + $0x178] sm:$0xff]  ;;  %v72_v35 = vld [vmem:[#allocation2 + $0x170] sm:$0xff] }
  0x19   :  { %98 = vmatpush1.msra.mxu0 %v46_v11  ;;  %v71_v36 = vld [vmem:[#allocation2 + $0x168] sm:$0xff]  ;;  %v70_v37 = vld [vmem:[#allocation2 + $0x160] sm:$0xff]  ;;  %v69_v38 = vld [vmem:[#allocation2 + $0x158] sm:$0xff] }
  0x1a   :  { %99 = vmatprep.subr.mxu0 %v45_v12  ;;  %v68_v39 = vld [vmem:[#allocation2 + $0x150] sm:$0xff]  ;;  %v67_v40 = vld [vmem:[#allocation2 + $0x148] sm:$0xff]  ;;  %v66_v41 = vld [vmem:[#allocation2 + $0x140] sm:$0xff] }
  0x1b   :  { %100 = vmatpush1.msra.mxu0 %v44_v13  ;;  %v65_v42 = vld [vmem:[#allocation2 + $0x138] sm:$0xff]  ;;  %v64_v43 = vld [vmem:[#allocation2 + $0x130] sm:$0xff]  ;;  %v63_v44 = vld [vmem:[#allocation2 + $0x128] sm:$0xff] }
  0x1c   :  { %101 = vmatprep.subr.mxu0 %v43_v14  ;;  %v62_v45 = vld [vmem:[#allocation2 + $0x120] sm:$0xff]  ;;  %v61_v46 = vld [vmem:[#allocation2 + $0x118] sm:$0xff]  ;;  %v60_v47 = vld [vmem:[#allocation2 + $0x110] sm:$0xff] }
  0x1d   :  { %102 = vmatpush1.msra.mxu0 %v42_v15  ;;  %v59_v48 = vld [vmem:[#allocation2 + $0x108] sm:$0xff]  ;;  %v58_v49 = vld [vmem:[#allocation2 + $0x100] sm:$0xff]  ;;  %vm171_vm3 = vmor %vm170_vm2, %vm169_vm1 }
  0x1e   :  { %103 = vmatprep.subr.mxu0 %v41_v16 }
  0x1f   :  { %104 = vmatpush1.msra.mxu0 %v40_v17 }
  0x20   :  { %105 = vmatprep.subr.mxu0 %v39_v18 }
  0x21   :  { %106 = vmatpush1.msra.mxu0 %v38_v20 }
  0x22   :  { %107 = vmatprep.subr.mxu0 %v37_v22 }
  0x23   :  { %108 = vmatpush1.msra.mxu0 %v36_v23 }
  0x24   :  { %109 = vmatprep.subr.mxu0 %v35_v24 }
  0x25   :  { %110 = vmatpush1.msra.mxu0 %v34_v25 }
  0x26   :  { %111 = vmatprep.subr.mxu0 %v33_v26 }
  0x27   :  { %112 = vmatpush1.msra.mxu0 %v32_v27 }
  0x28   :  { %113 = vmatprep.subr.mxu0 %v31_v28 }
  0x29   :  { %114 = vmatpush1.msra.mxu0 %v30_v29 }
  0x2a   :  { %115 = vmatprep.subr.mxu0 %v29_v30 }
  0x2b   :  { %116 = vmatpush1.msra.mxu0 %v28_v31 }
  0x2c   :  { %117 = vmatprep.subr.mxu0 %v27_v32 }
  0x2d   :  { %118 = vmatpush1.msra.mxu0 %v26_v33 }
  0x2e   :  { %135 = vmatprep.subr.mxu0 %v73_v34 }
  0x2f   :  { %136 = vmatpush2.msra.mxu0 %v72_v35 }
  0x30   :  { %137 = vmatprep.subr.mxu0 %v71_v36 }
  0x31   :  { %138 = vmatpush2.msra.mxu0 %v70_v37 }
  0x32   :  { %139 = vmatprep.subr.mxu0 %v69_v38 }
  0x33   :  { %140 = vmatpush2.msra.mxu0 %v68_v39 }
  0x34   :  { %141 = vmatprep.subr.mxu0 %v67_v40 }
  0x35   :  { %142 = vmatpush2.msra.mxu0 %v66_v41 }
  0x36   :  { %143 = vmatprep.subr.mxu0 %v65_v42 }
  0x37   :  { %144 = vmatpush2.msra.mxu0 %v64_v43 }
  0x38   :  { %145 = vmatprep.subr.mxu0 %v63_v44 }
  0x39   :  { %146 = vmatpush2.msra.mxu0 %v62_v45 }
  0x3a   :  { %147 = vmatprep.subr.mxu0 %v61_v46 }
  0x3b   :  { %148 = vmatpush2.msra.mxu0 %v60_v47 }
  0x3c   :  { %149 = vmatprep.subr.mxu0 %v59_v48 }
  0x3d   :  { %150 = vmatpush2.msra.mxu0 %v58_v49 }
  0x3e   :  { %152 = vmatmul.mubr.f32.vlgmr.msra.gmra.mxu0 %v231_v19 }
  0xfe   :  { %v153_v55 = vpop.f32.mrf.mxu0 }
 0x100   :  { %v155_v57 = vpop.f32.mrf.mxu0 }
 0x101   :  { %v160_v58 = vcombine.low %v153_v55, %v155_v57 }
 0x103   :  { %v167_v59 = vrot.slane %v160_v58, %v166_v56 }
 0x105   :  { %172 = vst.msk [vmem:[%s241_s2] sm:$0xf] %vm171_vm3, %v167_v59 }
 0x106   :  { %177 = vsyncpa [#allocation3], 1 }

// kernel: mwt_cz1d_forward.14
= control target key start
LH: loop header
LB: loop body
LE: loop exit
PB: predicated region body
PF: predicated region fallthrough
CT: control target
= control target key end

     0   :  { %v147_v0 = vmov 0.0   ;;  %vm148_vm0 = vmmov 0   ;;  %vm24_vm1 = vcmask 785408   ;;  %vm98_vm2 = vcmask 779264   ;;  %s206_s1 = inlined_call_operand.vmem [shape: f32[96,96], index: 1, kind: input, shape index: {}]   ;;  %s207_s0 = inlined_call_operand.vmem [shape: f32[2,96], index: 0, kind: input, shape index: {}]   ;;  %s208_s2 = inlined_call_operand.vmem [shape: f32[2,96], index: 2, kind: output, shape index: {}]  }
   0x1   :  { %118 = vmatprep.subr.mxu0 %v147_v0  ;;  %v23_v1 = vld [vmem:[%s206_s1 + $0x58] sm:$0xff]  ;;  %v22_v2 = vld [vmem:[%s206_s1 + $0x50] sm:$0xff]  ;;  %142 = vmatprep.mubr.msk.f32.mxu0 %vm148_vm0, %v147_v0  ;;  %v21_v3 = vld [vmem:[%s206_s1 + $0x48] sm:$0xff] }
   0x2   :  { %119 = vmatpush3.msra.mxu0 %v23_v1  ;;  %v20_v4 = vld [vmem:[%s206_s1 + $0x40] sm:$0xff]  ;;  %v19_v5 = vld [vmem:[%s206_s1 + $0x38] sm:$0xff]  ;;  %v18_v6 = vld [vmem:[%s206_s1 + $0x30] sm:$0xff] }
   0x3   :  { %120 = vmatprep.subr.mxu0 %v147_v0  ;;  %v17_v7 = vld [vmem:[%s206_s1 + $0x28] sm:$0xff]  ;;  %v16_v8 = vld [vmem:[%s206_s1 + $0x20] sm:$0xff]  ;;  %v15_v9 = vld [vmem:[%s206_s1 + $0x18] sm:$0xff] }
   0x4   :  { %121 = vmatpush3.msra.mxu0 %v22_v2  ;;  %v14_v10 = vld [vmem:[%s206_s1 + $0x10] sm:$0xff]  ;;  %v13_v11 = vld [vmem:[%s206_s1 + $0x8] sm:$0xff]  ;;  %v12_v12 = vld [vmem:[%s206_s1] sm:$0xff] }
   0x5   :  { %122 = vmatprep.subr.mxu0 %v147_v0  ;;  %v11_v13 = vld [vmem:[%s207_s0] sm:$0x3] }
   0x6   :  { %123 = vmatpush3.msra.mxu0 %v21_v3 }
   0x7   :  { %124 = vmatprep.subr.mxu0 %v147_v0 }
   0x8   :  { %125 = vmatpush3.msra.mxu0 %v20_v4 }
   0x9   :  { %126 = vmatprep.subr.mxu0 %v147_v0 }
   0xa   :  { %127 = vmatpush3.msra.mxu0 %v19_v5 }
   0xb   :  { %128 = vmatprep.subr.mxu0 %v147_v0 }
   0xc   :  { %129 = vmatpush3.msra.mxu0 %v18_v6 }
   0xd   :  { %130 = vmatprep.subr.mxu0 %v147_v0 }
   0xe   :  { %131 = vmatpush3.msra.mxu0 %v17_v7 }
   0xf   :  { %132 = vmatprep.subr.mxu0 %v147_v0 }
  0x10   :  { %133 = vmatpush3.msra.mxu0 %v16_v8 }
  0x11   :  { %134 = vmatprep.subr.mxu0 %v147_v0 }
  0x12   :  { %135 = vmatpush3.msra.mxu0 %v15_v9 }
  0x13   :  { %136 = vmatprep.subr.mxu0 %v147_v0 }
  0x14   :  { %137 = vmatpush3.msra.mxu0 %v14_v10 }
  0x15   :  { %138 = vmatprep.subr.mxu0 %v147_v0 }
  0x16   :  { %139 = vmatpush3.msra.mxu0 %v13_v11 }
  0x17   :  { %140 = vmatprep.subr.mxu0 %v147_v0 }
  0x18   :  { %141 = vmatpush3.msra.mxu0 %v12_v12 }
  0x19   :  { %143 = vmatmul.mubr.msk.f32.vlgmr.msra.gmra.mxu0 %vm24_vm1, %v11_v13 }
  0xd9   :  { %v94_v14 = vpop.f32.mrf.mxu0 }
  0xda   :  { %99 = vst.msk [vmem:[%s208_s2] sm:$0x3] %vm98_vm2, %v94_v14 }
  0xdb   :  { %v144_v15 = vpop.f32.mrf.mxu0 }

// kernel: mwt_cz1d_forward.24
= control target key start
LH: loop header
LB: loop body
LE: loop exit
PB: predicated region body
PF: predicated region fallthrough
CT: control target
= control target key end

     0   :  { %v1183_v3 = vmov 0.0   ;;  %s1176_s4 = inlined_call_operand.vmem [shape: f32[128,512], index: 4, kind: input, shape index: {}]   ;;  %s1177_s0 = inlined_call_operand.vmem [shape: f32[2,128], index: 0, kind: input, shape index: {}]   ;;  %s1178_s1 = inlined_call_operand.vmem [shape: f32[2,128], index: 1, kind: input, shape index: {}]   ;;  %s1179_s5 = inlined_call_operand.vmem [shape: f32[128,256], index: 5, kind: input, shape index: {}]   ;;  %s1180_s2 = inlined_call_operand.vmem [shape: f32[2,128], index: 2, kind: input, shape index: {}]   ;;  %s1181_s3 = inlined_call_operand.vmem [shape: f32[2,128], index: 3, kind: input, shape index: {}]   ;;  %s1182_s6 = inlined_call_operand.vmem [shape: f32[2,512], index: 6, kind: output, shape index: {}]  }
   0x1   :  { %v605_v0 = vld [vmem:[%s1176_s4 + $0x1e8] sm:$0xff]  ;;  %v610_v1 = vld [vmem:[%s1176_s4 + $0x1f8] sm:$0xff]  ;;  %v615_v2 = vld [vmem:[%s1176_s4 + $0x1e0] sm:$0xff]  ;;  %184 = vmatprep.mubr.f32.mxu0 %v1183_v3  ;;  %255 = vmatprep.mubr.f32.mxu1 %v1183_v3 }
   0x2   :  { %120 = vmatprep.subr.mxu0 %v605_v0  ;;  %191 = vmatprep.subr.mxu1 %v610_v1  ;;  %v624_v4 = vld [vmem:[%s1176_s4 + $0x1f0] sm:$0xff]  ;;  %v629_v5 = vld [vmem:[%s1176_s4 + $0x1c8] sm:$0xff]  ;;  %v634_v6 = vld [vmem:[%s1176_s4 + $0x1d8] sm:$0xff] }
   0x3   :  { %121 = vmatpush1.msra.mxu0 %v615_v2  ;;  %192 = vmatpush1.msra.mxu1 %v624_v4  ;;  %v641_v7 = vld [vmem:[%s1176_s4 + $0x1c0] sm:$0xff]  ;;  %v646_v8 = vld [vmem:[%s1176_s4 + $0x1d0] sm:$0xff]  ;;  %v651_v9 = vld [vmem:[%s1176_s4 + $0x1a8] sm:$0xff] }
   0x4   :  { %122 = vmatprep.subr.mxu0 %v629_v5  ;;  %193 = vmatprep.subr.mxu1 %v634_v6  ;;  %v658_v10 = vld [vmem:[%s1176_s4 + $0x1b8] sm:$0xff]  ;;  %v663_v11 = vld [vmem:[%s1176_s4 + $0x1a0] sm:$0xff]  ;;  %v668_v12 = vld [vmem:[%s1176_s4 + $0x1b0] sm:$0xff] }
   0x5   :  { %123 = vmatpush1.msra.mxu0 %v641_v7  ;;  %194 = vmatpush1.msra.mxu1 %v646_v8  ;;  %v675_v13 = vld [vmem:[%s1176_s4 + $0x188] sm:$0xff]  ;;  %v680_v14 = vld [vmem:[%s1176_s4 + $0x198] sm:$0xff]  ;;  %v687_v15 = vld [vmem:[%s1176_s4 + $0x180] sm:$0xff] }
   0x6   :  { %124 = vmatprep.subr.mxu0 %v651_v9  ;;  %195 = vmatprep.subr.mxu1 %v658_v10  ;;  %v692_v16 = vld [vmem:[%s1176_s4 + $0x190] sm:$0xff]  ;;  %v699_v17 = vld [vmem:[%s1176_s4 + $0x168] sm:$0xff]  ;;  %v704_v18 = vld [vmem:[%s1176_s4 + $0x178] sm:$0xff] }
   0x7   :  { %125 = vmatpush1.msra.mxu0 %v663_v11  ;;  %196 = vmatpush1.msra.mxu1 %v668_v12  ;;  %v711_v19 = vld [vmem:[%s1176_s4 + $0x160] sm:$0xff]  ;;  %v716_v20 = vld [vmem:[%s1176_s4 + $0x170] sm:$0xff]  ;;  %v723_v21 = vld [vmem:[%s1176_s4 + $0x148] sm:$0xff] }
   0x8   :  { %126 = vmatprep.subr.mxu0 %v675_v13  ;;  %197 = vmatprep.subr.mxu1 %v680_v14  ;;  %v728_v22 = vld [vmem:[%s1176_s4 + $0x158] sm:$0xff]  ;;  %v735_v23 = vld [vmem:[%s1176_s4 + $0x140] sm:$0xff]  ;;  %v740_v24 = vld [vmem:[%s1176_s4 + $0x150] sm:$0xff] }
   0x9   :  { %127 = vmatpush1.msra.mxu0 %v687_v15  ;;  %198 = vmatpush1.msra.mxu1 %v692_v16  ;;  %v747_v25 = vld [vmem:[%s1176_s4 + $0x128] sm:$0xff]  ;;  %v752_v26 = vld [vmem:[%s1176_s4 + $0x138] sm:$0xff]  ;;  %v759_v27 = vld [vmem:[%s1176_s4 + $0x120] sm:$0xff] }
   0xa   :  { %128 = vmatprep.subr.mxu0 %v699_v17  ;;  %199 = vmatprep.subr.mxu1 %v704_v18  ;;  %v764_v28 = vld [vmem:[%s1176_s4 + $0x130] sm:$0xff]  ;;  %v771_v29 = vld [vmem:[%s1176_s4 + $0x108] sm:$0xff]  ;;  %v776_v30 = vld [vmem:[%s1176_s4 + $0x118] sm:$0xff] }
   0xb   :  { %129 = vmatpush1.msra.mxu0 %v711_v19  ;;  %200 = vmatpush1.msra.mxu1 %v716_v20  ;;  %v783_v31 = vld [vmem:[%s1176_s4 + $0x100] sm:$0xff]  ;;  %v788_v32 = vld [vmem:[%s1176_s4 + $0x110] sm:$0xff]  ;;  %v795_v33 = vld [vmem:[%s1176_s4 + $0xe8] sm:$0xff] }
   0xc   :  { %130 = vmatprep.subr.mxu0 %v723_v21  ;;  %201 = vmatprep.subr.mxu1 %v728_v22  ;;  %v800_v34 = vld [vmem:[%s1176_s4 + $0xf8] sm:$0xff]  ;;  %v807_v35 = vld [vmem:[%s1176_s4 + $0xe0] sm:$0xff]  ;;  %v812_v36 = vld [vmem:[%s1176_s4 + $0xf0] sm:$0xff] }
   0xd   :  { %131 = vmatpush1.msra.mxu0 %v735_v23  ;;  %202 = vmatpush1.msra.mxu1 %v740_v24  ;;  %v819_v37 = vld [vmem:[%s1176_s4 + $0xc8] sm:$0xff]  ;;  %v824_v38 = vld [vmem:[%s1176_s4 + $0xd8] sm:$0xff]  ;;  %v831_v39 = vld [vmem:[%s1176_s4 + $0xc0] sm:$0xff] }
   0xe   :  { %132 = vmatprep.subr.mxu0 %v747_v25  ;;  %203 = vmatprep.subr.mxu1 %v752_v26  ;;  %v836_v40 = vld [vmem:[%s1176_s4 + $0xd0] sm:$0xff]  ;;  %v843_v41 = vld [vmem:[%s1176_s4 + $0xa8] sm:$0xff]  ;;  %v848_v42 = vld [vmem:[%s1176_s4 + $0xb8] sm:$0xff] }
   0xf   :  { %133 = vmatpush1.msra.mxu0 %v759_v27  ;;  %204 = vmatpush1.msra.mxu1 %v764_v28  ;;  %v855_v43 = vld [vmem:[%s1176_s4 + $0xa0] sm:$0xff]  ;;  %v860_v44 = vld [vmem:[%s1176_s4 + $0xb0] sm:$0xff]  ;;  %v867_v45 = vld [vmem:[%s1176_s4 + $0x88] sm:$0xff] }
  0x10   :  { %134 = vmatprep.subr.mxu0 %v771_v29  ;;  %205 = vmatprep.subr.mxu1 %v776_v30  ;;  %v872_v46 = vld [vmem:[%s1176_s4 + $0x98] sm:$0xff]  ;;  %v879_v47 = vld [vmem:[%s1176_s4 + $0x80] sm:$0xff]  ;;  %v884_v48 = vld [vmem:[%s1176_s4 + $0x90] sm:$0xff] }
  0x11   :  { %135 = vmatpush1.msra.mxu0 %v783_v31  ;;  %206 = vmatpush1.msra.mxu1 %v788_v32  ;;  %v891_v49 = vld [vmem:[%s1176_s4 + $0x68] sm:$0xff]  ;;  %v896_v50 = vld [vmem:[%s1176_s4 + $0x78] sm:$0xff]  ;;  %v903_v51 = vld [vmem:[%s1176_s4 + $0x60] sm:$0xff] }
  0x12   :  { %136 = vmatprep.subr.mxu0 %v795_v33  ;;  %207 = vmatprep.subr.mxu1 %v800_v34  ;;  %v908_v52 = vld [vmem:[%s1176_s4 + $0x70] sm:$0xff]  ;;  %v915_v53 = vld [vmem:[%s1176_s4 + $0x48] sm:$0xff]  ;;  %v920_v54 = vld [vmem:[%s1176_s4 + $0x58] sm:$0xff] }
  0x13   :  { %137 = vmatpush1.msra.mxu0 %v807_v35  ;;  %208 = vmatpush1.msra.mxu1 %v812_v36  ;;  %v927_v55 = vld [vmem:[%s1176_s4 + $0x40] sm:$0xff]  ;;  %v932_v56 = vld [vmem:[%s1176_s4 + $0x50] sm:$0xff]  ;;  %v939_v57 = vld [vmem:[%s1176_s4 + $0x28] sm:$0xff] }
  0x14   :  { %138 = vmatprep.subr.mxu0 %v819_v37  ;;  %209 = vmatprep.subr.mxu1 %v824_v38  ;;  %1186 = vst [vmem:[#allocation2_spill] sm:$0xff] %v939_v57  ;;  %v944_v58 = vld [vmem:[%s1176_s4 + $0x38] sm:$0xff]  ;;  %v951_v59 = vld [vmem:[%s1176_s4 + $0x20] sm:$0xff]  ;;  %v956_v60 = vld [vmem:[%s1176_s4 + $0x30] sm:$0xff] }
  0x15   :  { %139 = vmatpush1.msra.mxu0 %v831_v39  ;;  %210 = vmatpush1.msra.mxu1 %v836_v40  ;;  %v963_v61 = vld [vmem:[%s1176_s4 + $0x8] sm:$0xff]  ;;  %v968_v62 = vld [vmem:[%s1176_s4 + $0x18] sm:$0xff]  ;;  %v975_v63 = vld [vmem:[%s1176_s4] sm:$0xff] }
  0x16   :  { %140 = vmatprep.subr.mxu0 %v843_v41  ;;  %211 = vmatprep.subr.mxu1 %v848_v42  ;;  %v980_v3 = vld [vmem:[%s1176_s4 + $0x10] sm:$0xff] }
  0x17   :  { %141 = vmatpush1.msra.mxu0 %v855_v43  ;;  %212 = vmatpush1.msra.mxu1 %v860_v44 }
  0x18   :  { %142 = vmatprep.subr.mxu0 %v867_v45  ;;  %213 = vmatprep.subr.mxu1 %v872_v46 }
  0x19   :  { %143 = vmatpush1.msra.mxu0 %v879_v47  ;;  %214 = vmatpush1.msra.mxu1 %v884_v48 }
  0x1a   :  { %144 = vmatprep.subr.mxu0 %v891_v49  ;;  %215 = vmatprep.subr.mxu1 %v896_v50 }
  0x1b   :  { %145 = vmatpush1.msra.mxu0 %v903_v51  ;;  %216 = vmatpush1.msra.mxu1 %v908_v52 }
  0x1c   :  { %146 = vmatprep.subr.mxu0 %v915_v53  ;;  %217 = vmatprep.subr.mxu1 %v920_v54 }
  0x1d   :  { %147 = vmatpush1.msra.mxu0 %v927_v55  ;;  %218 = vmatpush1.msra.mxu1 %v932_v56 }
  0x1e   :  { %148 = vmatprep.subr.mxu0 %v939_v57  ;;  %219 = vmatprep.subr.mxu1 %v944_v58  ;;  %v119_v57 = vld [vmem:[%s1177_s0] sm:$0x3] }
  0x1f   :  { %149 = vmatpush1.msra.mxu0 %v951_v59  ;;  %220 = vmatpush1.msra.mxu1 %v956_v60 }
  0x20   :  { %150 = vmatprep.subr.mxu0 %v963_v61  ;;  %221 = vmatprep.subr.mxu1 %v968_v62 }
  0x21   :  { %151 = vmatpush1.msra.mxu0 %v975_v63  ;;  %222 = vmatpush1.msra.mxu1 %v980_v3 }
  0x22   :  { %185 = vmatmul.mubr.f32.vlgmr.msra.gmra.mxu0 %v119_v57  ;;  %263 = vmatprep.subr.mxu0 %v605_v0  ;;  %v1187_v0 = vld [vmem:[#allocation2_spill] sm:$0xff] }
  0x23   :  { %334 = vmatprep.subr.mxu1 %v610_v1  ;;  %256 = vmatmul.mubr.f32.vlgmr.msra.gmra.mxu1 %v119_v57  ;;  %v262_v1 = vld [vmem:[%s1178_s1] sm:$0x3] }
  0x24   :  { %264 = vmatpush1.msra.mxu0 %v615_v2  ;;  %335 = vmatpush1.msra.mxu1 %v624_v4  ;;  %v1188_v2 = vmov 0.0   ;;  %v118_v4 = vld [vmem:[%s1179_s5 + $0xf8] sm:$0xff] }
  0x25   :  { %265 = vmatprep.subr.mxu0 %v629_v5  ;;  %336 = vmatprep.subr.mxu1 %v634_v6  ;;  %v117_v5 = vld [vmem:[%s1179_s5 + $0xf0] sm:$0xff]  ;;  %v116_v6 = vld [vmem:[%s1179_s5 + $0xe8] sm:$0xff] }
  0x26   :  { %266 = vmatpush1.msra.mxu0 %v641_v7  ;;  %337 = vmatpush1.msra.mxu1 %v646_v8  ;;  %v115_v7 = vld [vmem:[%s1179_s5 + $0xe0] sm:$0xff]  ;;  %v113_v8 = vld [vmem:[%s1179_s5 + $0xd0] sm:$0xff] }
  0x27   :  { %267 = vmatprep.subr.mxu0 %v651_v9  ;;  %338 = vmatprep.subr.mxu1 %v658_v10  ;;  %v112_v9 = vld [vmem:[%s1179_s5 + $0xc8] sm:$0xff]  ;;  %v111_v10 = vld [vmem:[%s1179_s5 + $0xc0] sm:$0xff] }
  0x28   :  { %268 = vmatpush1.msra.mxu0 %v663_v11  ;;  %339 = vmatpush1.msra.mxu1 %v668_v12  ;;  %v110_v11 = vld [vmem:[%s1179_s5 + $0xb8] sm:$0xff]  ;;  %v109_v12 = vld [vmem:[%s1179_s5 + $0xb0] sm:$0xff] }
  0x29   :  { %269 = vmatprep.subr.mxu0 %v675_v13  ;;  %340 = vmatprep.subr.mxu1 %v680_v14  ;;  %v108_v13 = vld [vmem:[%s1179_s5 + $0xa8] sm:$0xff]  ;;  %v107_v14 = vld [vmem:[%s1179_s5 + $0xa0] sm:$0xff] }
  0x2a   :  { %270 = vmatpush1.msra.mxu0 %v687_v15  ;;  %341 = vmatpush1.msra.mxu1 %v692_v16  ;;  %v106_v15 = vld [vmem:[%s1179_s5 + $0x98] sm:$0xff]  ;;  %v105_v16 = vld [vmem:[%s1179_s5 + $0x90] sm:$0xff] }
  0x2b   :  { %271 = vmatprep.subr.mxu0 %v699_v17  ;;  %342 = vmatprep.subr.mxu1 %v704_v18  ;;  %v104_v17 = vld [vmem:[%s1179_s5 + $0x88] sm:$0xff]  ;;  %v103_v18 = vld [vmem:[%s1179_s5 + $0x80] sm:$0xff] }
  0x2c   :  { %272 = vmatpush1.msra.mxu0 %v711_v19  ;;  %343 = vmatpush1.msra.mxu1 %v716_v20  ;;  %v102_v19 = vld [vmem:[%s1179_s5 + $0x78] sm:$0xff]  ;;  %v101_v20 = vld [vmem:[%s1179_s5 + $0x70] sm:$0xff] }
  0x2d   :  { %273 = vmatprep.subr.mxu0 %v723_v21  ;;  %344 = vmatprep.subr.mxu1 %v728_v22  ;;  %v100_v21 = vld [vmem:[%s1179_s5 + $0x68] sm:$0xff]  ;;  %v99_v22 = vld [vmem:[%s1179_s5 + $0x60] sm:$0xff] }
  0x2e   :  { %274 = vmatpush1.msra.mxu0 %v735_v23  ;;  %345 = vmatpush1.msra.mxu1 %v740_v24  ;;  %v98_v23 = vld [vmem:[%s1179_s5 + $0x58] sm:$0xff]  ;;  %v97_v24 = vld [vmem:[%s1179_s5 + $0x50] sm:$0xff] }
  0x2f   :  { %275 = vmatprep.subr.mxu0 %v747_v25  ;;  %346 = vmatprep.subr.mxu1 %v752_v26  ;;  %v96_v25 = vld [vmem:[%s1179_s5 + $0x48] sm:$0xff]  ;;  %v95_v26 = vld [vmem:[%s1179_s5 + $0x40] sm:$0xff] }
  0x30   :  { %276 = vmatpush1.msra.mxu0 %v759_v27  ;;  %347 = vmatpush1.msra.mxu1 %v764_v28  ;;  %v94_v27 = vld [vmem:[%s1179_s5 + $0x38] sm:$0xff]  ;;  %v93_v28 = vld [vmem:[%s1179_s5 + $0x30] sm:$0xff] }
  0x31   :  { %277 = vmatprep.subr.mxu0 %v771_v29  ;;  %348 = vmatprep.subr.mxu1 %v776_v30  ;;  %v92_v29 = vld [vmem:[%s1179_s5 + $0x28] sm:$0xff]  ;;  %v91_v30 = vld [vmem:[%s1179_s5 + $0x20] sm:$0xff] }
  0x32   :  { %278 = vmatpush1.msra.mxu0 %v783_v31  ;;  %349 = vmatpush1.msra.mxu1 %v788_v32  ;;  %v90_v31 = vld [vmem:[%s1179_s5 + $0x18] sm:$0xff]  ;;  %v89_v32 = vld [vmem:[%s1179_s5 + $0x10] sm:$0xff] }
  0x33   :  { %279 = vmatprep.subr.mxu0 %v795_v33  ;;  %350 = vmatprep.subr.mxu1 %v800_v34  ;;  %v88_v33 = vld [vmem:[%s1179_s5 + $0x8] sm:$0xff]  ;;  %v87_v34 = vld [vmem:[%s1179_s5] sm:$0xff] }
  0x34   :  { %280 = vmatpush1.msra.mxu0 %v807_v35  ;;  %351 = vmatpush1.msra.mxu1 %v812_v36  ;;  %v405_v35 = vld [vmem:[%s1180_s2] sm:$0x3] }
  0x35   :  { %281 = vmatprep.subr.mxu0 %v819_v37  ;;  %352 = vmatprep.subr.mxu1 %v824_v38  ;;  %v477_v36 = vld [vmem:[%s1181_s3] sm:$0x3] }
  0x36   :  { %282 = vmatpush1.msra.mxu0 %v831_v39  ;;  %353 = vmatpush1.msra.mxu1 %v836_v40 }
  0x37   :  { %283 = vmatprep.subr.mxu0 %v843_v41  ;;  %354 = vmatprep.subr.mxu1 %v848_v42 }
  0x38   :  { %284 = vmatpush1.msra.mxu0 %v855_v43  ;;  %355 = vmatpush1.msra.mxu1 %v860_v44 }
  0x39   :  { %285 = vmatprep.subr.mxu0 %v867_v45  ;;  %356 = vmatprep.subr.mxu1 %v872_v46 }
  0x3a   :  { %286 = vmatpush1.msra.mxu0 %v879_v47  ;;  %357 = vmatpush1.msra.mxu1 %v884_v48 }
  0x3b   :  { %287 = vmatprep.subr.mxu0 %v891_v49  ;;  %358 = vmatprep.subr.mxu1 %v896_v50 }
  0x3c   :  { %288 = vmatpush1.msra.mxu0 %v903_v51  ;;  %359 = vmatpush1.msra.mxu1 %v908_v52 }
  0x3d   :  { %289 = vmatprep.subr.mxu0 %v915_v53  ;;  %360 = vmatprep.subr.mxu1 %v920_v54 }
  0x3e   :  { %290 = vmatpush1.msra.mxu0 %v927_v55  ;;  %361 = vmatpush1.msra.mxu1 %v932_v56 }
  0x3f   :  { %291 = vmatprep.subr.mxu0 %v1187_v0  ;;  %362 = vmatprep.subr.mxu1 %v944_v58 }
  0x40   :  { %292 = vmatpush1.msra.mxu0 %v951_v59  ;;  %363 = vmatpush1.msra.mxu1 %v956_v60 }
  0x41   :  { %293 = vmatprep.subr.mxu0 %v963_v61  ;;  %364 = vmatprep.subr.mxu1 %v968_v62 }
  0x42   :  { %294 = vmatpush1.msra.mxu0 %v975_v63  ;;  %327 = vmatprep.mubr.f32.mxu0 %v1188_v2 }
  0x43   :  { %365 = vmatpush1.msra.mxu1 %v980_v3  ;;  %398 = vmatprep.mubr.f32.mxu1 %v1188_v2  ;;  %v114_v3 = vld [vmem:[%s1179_s5 + $0xd8] sm:$0xff] }
  0x44   :  { %328 = vmatmul.mubr.f32.vlgmr.msra.gmra.mxu0 %v262_v1  ;;  %399 = vmatmul.mubr.f32.vlgmr.msra.gmra.mxu1 %v262_v1 }
  0x45   :  { %406 = vmatprep.subr.mxu0 %v118_v4  ;;  %478 = vmatprep.subr.mxu1 %v118_v4 }
  0x46   :  { %407 = vmatpush1.msra.mxu0 %v117_v5  ;;  %479 = vmatpush1.msra.mxu1 %v117_v5 }
  0x47   :  { %408 = vmatprep.subr.mxu0 %v116_v6  ;;  %480 = vmatprep.subr.mxu1 %v116_v6 }
  0x48   :  { %409 = vmatpush1.msra.mxu0 %v115_v7  ;;  %481 = vmatpush1.msra.mxu1 %v115_v7 }
  0x49   :  { %410 = vmatprep.subr.mxu0 %v114_v3  ;;  %482 = vmatprep.subr.mxu1 %v114_v3 }
  0x4a   :  { %411 = vmatpush1.msra.mxu0 %v113_v8  ;;  %483 = vmatpush1.msra.mxu1 %v113_v8 }
  0x4b   :  { %412 = vmatprep.subr.mxu0 %v112_v9  ;;  %484 = vmatprep.subr.mxu1 %v112_v9 }
  0x4c   :  { %413 = vmatpush1.msra.mxu0 %v111_v10  ;;  %485 = vmatpush1.msra.mxu1 %v111_v10 }
  0x4d   :  { %414 = vmatprep.subr.mxu0 %v110_v11  ;;  %486 = vmatprep.subr.mxu1 %v110_v11 }
  0x4e   :  { %415 = vmatpush1.msra.mxu0 %v109_v12  ;;  %487 = vmatpush1.msra.mxu1 %v109_v12 }
  0x4f   :  { %416 = vmatprep.subr.mxu0 %v108_v13  ;;  %488 = vmatprep.subr.mxu1 %v108_v13 }
  0x50   :  { %417 = vmatpush1.msra.mxu0 %v107_v14  ;;  %489 = vmatpush1.msra.mxu1 %v107_v14 }
  0x51   :  { %418 = vmatprep.subr.mxu0 %v106_v15  ;;  %490 = vmatprep.subr.mxu1 %v106_v15 }
  0x52   :  { %419 = vmatpush1.msra.mxu0 %v105_v16  ;;  %491 = vmatpush1.msra.mxu1 %v105_v16 }
  0x53   :  { %420 = vmatprep.subr.mxu0 %v104_v17  ;;  %492 = vmatprep.subr.mxu1 %v104_v17 }
  0x54   :  { %421 = vmatpush1.msra.mxu0 %v103_v18  ;;  %493 = vmatpush1.msra.mxu1 %v103_v18 }
  0x55   :  { %422 = vmatprep.subr.mxu0 %v102_v19  ;;  %494 = vmatprep.subr.mxu1 %v102_v19 }
  0x56   :  { %423 = vmatpush1.msra.mxu0 %v101_v20  ;;  %495 = vmatpush1.msra.mxu1 %v101_v20 }
  0x57   :  { %424 = vmatprep.subr.mxu0 %v100_v21  ;;  %496 = vmatprep.subr.mxu1 %v100_v21 }
  0x58   :  { %425 = vmatpush1.msra.mxu0 %v99_v22  ;;  %497 = vmatpush1.msra.mxu1 %v99_v22 }
  0x59   :  { %426 = vmatprep.subr.mxu0 %v98_v23  ;;  %498 = vmatprep.subr.mxu1 %v98_v23 }
  0x5a   :  { %427 = vmatpush1.msra.mxu0 %v97_v24  ;;  %499 = vmatpush1.msra.mxu1 %v97_v24 }
  0x5b   :  { %428 = vmatprep.subr.mxu0 %v96_v25  ;;  %500 = vmatprep.subr.mxu1 %v96_v25 }
  0x5c   :  { %429 = vmatpush1.msra.mxu0 %v95_v26  ;;  %501 = vmatpush1.msra.mxu1 %v95_v26 }
  0x5d   :  { %430 = vmatprep.subr.mxu0 %v94_v27  ;;  %502 = vmatprep.subr.mxu1 %v94_v27 }
  0x5e   :  { %431 = vmatpush1.msra.mxu0 %v93_v28  ;;  %503 = vmatpush1.msra.mxu1 %v93_v28 }
  0x5f   :  { %432 = vmatprep.subr.mxu0 %v92_v29  ;;  %504 = vmatprep.subr.mxu1 %v92_v29 }
  0x60   :  { %433 = vmatpush1.msra.mxu0 %v91_v30  ;;  %505 = vmatpush1.msra.mxu1 %v91_v30 }
  0x61   :  { %434 = vmatprep.subr.mxu0 %v90_v31  ;;  %506 = vmatprep.subr.mxu1 %v90_v31 }
  0x62   :  { %435 = vmatpush1.msra.mxu0 %v89_v32  ;;  %507 = vmatpush1.msra.mxu1 %v89_v32 }
  0x63   :  { %436 = vmatprep.subr.mxu0 %v88_v33  ;;  %508 = vmatprep.subr.mxu1 %v88_v33 }
  0x64   :  { %437 = vmatpush1.msra.mxu0 %v87_v34  ;;  %470 = vmatprep.mubr.f32.mxu0 %v1188_v2 }
  0x65   :  { %509 = vmatpush1.msra.mxu1 %v87_v34  ;;  %542 = vmatprep.mubr.f32.mxu1 %v1188_v2 }
  0x66   :  { %471 = vmatmul.mubr.f32.vlgmr.msra.gmra.mxu0 %v405_v35  ;;  %543 = vmatmul.mubr.f32.vlgmr.msra.gmra.mxu1 %v477_v36 }
  0xe2   :  { %v186_v43 = vpop.f32.mrf.mxu0 }
  0xe3   :  { %v257_v37 = vpop.f32.mrf.mxu1 }
  0xe4   :  { %v188_v44 = vpop.f32.mrf.mxu0 }
  0xe5   :  { %v259_v38 = vpop.f32.mrf.mxu1 }
 0x104   :  { %v400_v39 = vpop.f32.mrf.mxu1  ;;  %v329_v45 = vpop.f32.mrf.mxu0 }
 0x105   :  { %v559_v40 = vadd.f32 %v400_v39, %v259_v38  ;;  %v553_v50 = vadd.f32 %v329_v45, %v188_v44 }
 0x106   :  { %v402_v41 = vpop.f32.mrf.mxu1  ;;  %v331_v46 = vpop.f32.mrf.mxu0 }
 0x107   :  { %560 = vst [vmem:[%s1182_s6 + $0x6] sm:$0x3] %v559_v40  ;;  %v557_v42 = vsub.f32 %v257_v37, %v402_v41  ;;  %v549_v47 = vsub.f32 %v186_v43, %v331_v46 }
 0x109   :  { %558 = vst [vmem:[%s1182_s6 + $0x4] sm:$0x3] %v557_v42 }
 0x126   :  { %v472_v48 = vpop.f32.mrf.mxu0  ;;  %v544_v49 = vpop.f32.mrf.mxu1 }
 0x127   :  { %v550_v51 = vadd.f32 %v549_v47, %v472_v48 }
 0x128   :  { %v474_v52 = vpop.f32.mrf.mxu0  ;;  %v546_v53 = vpop.f32.mrf.mxu1 }
 0x129   :  { %v554_v54 = vadd.f32 %v553_v50, %v474_v52  ;;  %v551_v55 = vsub.f32 %v550_v51, %v546_v53 }
 0x12b   :  { %v555_v56 = vadd.f32 %v554_v54, %v544_v49  ;;  %552 = vst [vmem:[%s1182_s6] sm:$0x3] %v551_v55 }
 0x12d   :  { %556 = vst [vmem:[%s1182_s6 + $0x2] sm:$0x3] %v555_v56 }

// kernel: mwt_cz1d_forward.15
= control target key start
LH: loop header
LB: loop body
LE: loop exit
PB: predicated region body
PF: predicated region fallthrough
CT: control target
= control target key end

     0   :  { %v123_v0 = vmov 0.0   ;;  %vm124_vm0 = vmmov 0   ;;  %vm18_vm1 = vcmask 392192   ;;  %vm92_vm2 = vcmask 386048   ;;  %s164_s1 = inlined_call_operand.vmem [shape: f32[48,48], index: 1, kind: input, shape index: {}]   ;;  %s165_s0 = inlined_call_operand.vmem [shape: f32[2,48], index: 0, kind: input, shape index: {}]   ;;  %s166_s2 = inlined_call_operand.vmem [shape: f32[2,48], index: 2, kind: output, shape index: {}]  }
   0x1   :  { %106 = vmatprep.subr.mxu0 %v123_v0  ;;  %v17_v1 = vld [vmem:[%s164_s1 + $0x28] sm:$0xff]  ;;  %v16_v2 = vld [vmem:[%s164_s1 + $0x20] sm:$0xff]  ;;  %118 = vmatprep.mubr.msk.f32.mxu0 %vm124_vm0, %v123_v0  ;;  %v15_v3 = vld [vmem:[%s164_s1 + $0x18] sm:$0xff] }
   0x2   :  { %107 = vmatpush3.msra.mxu0 %v17_v1  ;;  %v14_v4 = vld [vmem:[%s164_s1 + $0x10] sm:$0xff]  ;;  %v13_v5 = vld [vmem:[%s164_s1 + $0x8] sm:$0xff]  ;;  %v12_v6 = vld [vmem:[%s164_s1] sm:$0xff] }
   0x3   :  { %108 = vmatprep.subr.mxu0 %v123_v0  ;;  %v11_v7 = vld [vmem:[%s165_s0] sm:$0x3] }
   0x4   :  { %109 = vmatpush3.msra.mxu0 %v16_v2 }
   0x5   :  { %110 = vmatprep.subr.mxu0 %v123_v0 }
   0x6   :  { %111 = vmatpush3.msra.mxu0 %v15_v3 }
   0x7   :  { %112 = vmatprep.subr.mxu0 %v123_v0 }
   0x8   :  { %113 = vmatpush3.msra.mxu0 %v14_v4 }
   0x9   :  { %114 = vmatprep.subr.mxu0 %v123_v0 }
   0xa   :  { %115 = vmatpush3.msra.mxu0 %v13_v5 }
   0xb   :  { %116 = vmatprep.subr.mxu0 %v123_v0 }
   0xc   :  { %117 = vmatpush3.msra.mxu0 %v12_v6 }
   0xd   :  { %119 = vmatmul.mubr.msk.f32.vlgmr.msra.gmra.mxu0 %vm18_vm1, %v11_v7 }
  0xcd   :  { %v88_v8 = vpop.f32.mrf.mxu0 }
  0xce   :  { %93 = vst.msk [vmem:[%s166_s2] sm:$0x3] %vm92_vm2, %v88_v8 }
  0xcf   :  { %v120_v9 = vpop.f32.mrf.mxu0 }

// kernel: mwt_cz1d_forward.16
= control target key start
LH: loop header
LB: loop body
LE: loop exit
PB: predicated region body
PF: predicated region fallthrough
CT: control target
= control target key end

     0   :  { %v111_v0 = vmov 0.0   ;;  %vm112_vm0 = vmmov 0   ;;  %vm15_vm1 = vcmask 195584   ;;  %vm89_vm2 = vcmask 189440   ;;  %s143_s1 = inlined_call_operand.vmem [shape: f32[24,24], index: 1, kind: input, shape index: {}]   ;;  %s144_s0 = inlined_call_operand.vmem [shape: f32[2,24], index: 0, kind: input, shape index: {}]   ;;  %s145_s2 = inlined_call_operand.vmem [shape: f32[2,24], index: 2, kind: output, shape index: {}]  }
   0x1   :  { %100 = vmatprep.subr.mxu0 %v111_v0  ;;  %v14_v1 = vld [vmem:[%s143_s1 + $0x10] sm:$0xff]  ;;  %v13_v2 = vld [vmem:[%s143_s1 + $0x8] sm:$0xff]  ;;  %106 = vmatprep.mubr.msk.f32.mxu0 %vm112_vm0, %v111_v0  ;;  %v12_v3 = vld [vmem:[%s143_s1] sm:$0xff] }
   0x2   :  { %101 = vmatpush3.msra.mxu0 %v14_v1  ;;  %v11_v4 = vld [vmem:[%s144_s0] sm:$0x3] }
   0x3   :  { %102 = vmatprep.subr.mxu0 %v111_v0 }
   0x4   :  { %103 = vmatpush3.msra.mxu0 %v13_v2 }
   0x5   :  { %104 = vmatprep.subr.mxu0 %v111_v0 }
   0x6   :  { %105 = vmatpush3.msra.mxu0 %v12_v3 }
   0x7   :  { %107 = vmatmul.mubr.msk.f32.vlgmr.msra.gmra.mxu0 %vm15_vm1, %v11_v4 }
  0xc7   :  { %v85_v5 = vpop.f32.mrf.mxu0 }
  0xc8   :  { %90 = vst.msk [vmem:[%s145_s2] sm:$0x3] %vm89_vm2, %v85_v5 }
  0xc9   :  { %v108_v6 = vpop.f32.mrf.mxu0 }

// kernel: mwt_cz1d_forward.17
= control target key start
LH: loop header
LB: loop body
LE: loop exit
PB: predicated region body
PF: predicated region fallthrough
CT: control target
= control target key end

     0   :  { %vm28_vm0 = vcmask 1043456   ;;  %v123_v0 = vmov 0.0   ;;  %vm124_vm1 = vmmov 0   ;;  %vm24_vm2 = vcmask 97280   ;;  %s160_s1 = inlined_call_operand.vmem [shape: f32[12,12], index: 1, kind: input, shape index: {}]   ;;  %s161_s0 = inlined_call_operand.vmem [shape: f32[2,12], index: 0, kind: input, shape index: {}]   ;;  %s162_s2 = inlined_call_operand.vmem [shape: f32[1,12], index: 2, kind: input, shape index: {}]   ;;  %s163_s3 = inlined_call_operand.vmem [shape: f32[2,12], index: 3, kind: output, shape index: {}]  }
   0x1   :  { %114 = vmatprep.subr.mxu0 %v123_v0  ;;  %v16_v1 = vld [vmem:[%s160_s1 + $0x8] sm:$0xf]  ;;  %v15_v2 = vld [vmem:[%s160_s1] sm:$0xff]  ;;  %118 = vmatprep.mubr.msk.f32.mxu0 %vm124_vm1, %v123_v0  ;;  %vm102_vm3 = vcmask 91136  }
   0x2   :  { %115 = vmatpush3.msk.msra.mxu0 %vm28_vm0, %v16_v1  ;;  %v14_v3 = vld [vmem:[%s161_s0] sm:$0x3] }
   0x3   :  { %116 = vmatprep.subr.mxu0 %v123_v0  ;;  %v108_v4 = vld [vmem:[%s162_s2] ss:$0 sm:$0xff] }
   0x4   :  { %117 = vmatpush3.msra.mxu0 %v15_v2 }
   0x5   :  { %119 = vmatmul.mubr.msk.f32.vlgmr.msra.gmra.mxu0 %vm24_vm2, %v14_v3 }
  0xc5   :  { %v98_v5 = vpop.f32.mrf.mxu0 }
  0xc6   :  { %v99_v6 = vadd.f32 %v108_v4, %v98_v5 }
  0xc7   :  { %v120_v7 = vpop.f32.mrf.mxu0 }
  0xc8   :  { %103 = vst.msk [vmem:[%s163_s3] sm:$0x3] %vm102_vm3, %v99_v6 }

// kernel: mwt_cz1d_forward.21
= control target key start
LH: loop header
LB: loop body
LE: loop exit
PB: predicated region body
PF: predicated region fallthrough
CT: control target
= control target key end

     0   :  { %v221_v0 = vmov 0.0   ;;  %vm222_vm0 = vmmov 0   ;;  %vm102_vm1 = vcmask 195584   ;;  %vm28_vm2 = vcmask 392192   ;;  %s286_s3 = inlined_call_operand.vmem [shape: f32[48,48], index: 3, kind: input, shape index: {}]   ;;  %s287_s2 = inlined_call_operand.vmem [shape: f32[24,48], index: 2, kind: input, shape index: {}]   ;;  %s288_s0 = inlined_call_operand.vmem [shape: f32[2,24], index: 0, kind: input, shape index: {}]   ;;  %s289_s1 = inlined_call_operand.vmem [shape: f32[2,48], index: 1, kind: input, shape index: {}]   ;;  %s290_s4 = inlined_call_operand.vmem [shape: f32[2,48], index: 4, kind: output, shape index: {}]  }
   0x1   :  { %195 = vmatprep.subr.mxu0 %v221_v0  ;;  %v27_v1 = vld [vmem:[%s286_s3 + $0x28] sm:$0xff]  ;;  %v26_v2 = vld [vmem:[%s286_s3 + $0x20] sm:$0xff]  ;;  %210 = vmatprep.subr.mxu1 %v221_v0  ;;  %v20_v3 = vld [vmem:[%s287_s2 + $0x10] sm:$0xff]  ;;  %vm176_vm3 = vcmask 386048  }
   0x2   :  { %196 = vmatpush3.msra.mxu0 %v27_v1  ;;  %v19_v4 = vld [vmem:[%s287_s2 + $0x8] sm:$0xff]  ;;  %216 = vmatprep.mubr.msk.f32.mxu1 %vm222_vm0, %v221_v0  ;;  %v25_v5 = vld [vmem:[%s286_s3 + $0x18] sm:$0xff]  ;;  %v18_v6 = vld [vmem:[%s287_s2] sm:$0xff] }
   0x3   :  { %197 = vmatprep.subr.mxu0 %v221_v0  ;;  %211 = vmatpush3.msra.mxu1 %v20_v3  ;;  %v24_v7 = vld [vmem:[%s286_s3 + $0x10] sm:$0xff]  ;;  %v17_v8 = vld [vmem:[%s288_s0] sm:$0x3]  ;;  %v23_v9 = vld [vmem:[%s286_s3 + $0x8] sm:$0xff] }
   0x4   :  { %198 = vmatpush3.msra.mxu0 %v26_v2  ;;  %212 = vmatprep.subr.mxu1 %v221_v0  ;;  %v22_v10 = vld [vmem:[%s286_s3] sm:$0xff] }
   0x5   :  { %199 = vmatprep.subr.mxu0 %v221_v0  ;;  %213 = vmatpush3.msra.mxu1 %v19_v4  ;;  %v21_v11 = vld [vmem:[%s289_s1] sm:$0x3] }
   0x6   :  { %200 = vmatpush3.msra.mxu0 %v25_v5  ;;  %214 = vmatprep.subr.mxu1 %v221_v0 }
   0x7   :  { %201 = vmatprep.subr.mxu0 %v221_v0  ;;  %215 = vmatpush3.msra.mxu1 %v18_v6 }
   0x8   :  { %202 = vmatpush3.msra.mxu0 %v24_v7  ;;  %217 = vmatmul.mubr.msk.f32.vlgmr.msra.gmra.mxu1 %vm102_vm1, %v17_v8 }
   0x9   :  { %203 = vmatprep.subr.mxu0 %v221_v0  ;;  %207 = vmatprep.mubr.msk.f32.mxu0 %vm222_vm0, %v221_v0 }
   0xa   :  { %204 = vmatpush3.msra.mxu0 %v23_v9 }
   0xb   :  { %205 = vmatprep.subr.mxu0 %v221_v0 }
   0xc   :  { %206 = vmatpush3.msra.mxu0 %v22_v10 }
   0xd   :  { %208 = vmatmul.mubr.msk.f32.vlgmr.msra.gmra.mxu0 %vm28_vm2, %v21_v11 }
  0xc8   :  { %v172_v12 = vpop.f32.mrf.mxu1 }
  0xca   :  { %v218_v13 = vpop.f32.mrf.mxu1 }
  0xcd   :  { %v98_v14 = vpop.f32.mrf.mxu0 }
  0xce   :  { %v173_v15 = vadd.f32 %v172_v12, %v98_v14 }
  0xcf   :  { %v209_v16 = vpop.f32.mrf.mxu0 }
  0xd0   :  { %177 = vst.msk [vmem:[%s290_s4] sm:$0x3] %vm176_vm3, %v173_v15 }

// kernel: mwt_cz1d_forward.19
= control target key start
LH: loop header
LB: loop body
LE: loop exit
PB: predicated region body
PF: predicated region fallthrough
CT: control target
= control target key end

     0   :  { %vm102_vm0 = vcmask 1043456   ;;  %v210_v0 = vmov 0.0   ;;  %vm98_vm1 = vcmask 97280   ;;  %vm211_vm2 = vmmov 0   ;;  %s261_s3 = inlined_call_operand.vmem [shape: f32[24,24], index: 3, kind: input, shape index: {}]   ;;  %s262_s2 = inlined_call_operand.vmem [shape: f32[12,24], index: 2, kind: input, shape index: {}]   ;;  %s263_s0 = inlined_call_operand.vmem [shape: f32[2,12], index: 0, kind: input, shape index: {}]   ;;  %s264_s1 = inlined_call_operand.vmem [shape: f32[2,24], index: 1, kind: input, shape index: {}]   ;;  %s265_s4 = inlined_call_operand.vmem [shape: f32[2,24], index: 4, kind: output, shape index: {}]  }
   0x1   :  { %192 = vmatprep.subr.mxu0 %v210_v0  ;;  %201 = vmatprep.subr.mxu1 %v210_v0  ;;  %v23_v1 = vld [vmem:[%s261_s3 + $0x10] sm:$0xff]  ;;  %v19_v2 = vld [vmem:[%s262_s2 + $0x8] sm:$0xf]  ;;  %v18_v4 = vld [vmem:[%s262_s2] sm:$0xff]  ;;  %vm24_vm3 = vcmask 195584   ;;  %vm176_vm4 = vcmask 189440  }
   0x2   :  { %v22_v3 = vld [vmem:[%s261_s3 + $0x8] sm:$0xff]  ;;  %193 = vmatpush3.msra.mxu0 %v23_v1  ;;  %202 = vmatpush3.msk.msra.mxu1 %vm102_vm0, %v19_v2  ;;  %v17_v5 = vld [vmem:[%s263_s0] sm:$0x3] }
   0x3   :  { %194 = vmatprep.subr.mxu0 %v210_v0  ;;  %203 = vmatprep.subr.mxu1 %v210_v0  ;;  %v21_v6 = vld [vmem:[%s261_s3] sm:$0xff] }
   0x4   :  { %195 = vmatpush3.msra.mxu0 %v22_v3  ;;  %204 = vmatpush3.msra.mxu1 %v18_v4  ;;  %v20_v7 = vld [vmem:[%s264_s1] sm:$0x3] }
   0x5   :  { %205 = vmatprep.mubr.msk.f32.mxu1 %vm211_vm2, %v210_v0  ;;  %196 = vmatprep.subr.mxu0 %v210_v0 }
   0x6   :  { %206 = vmatmul.mubr.msk.f32.vlgmr.msra.gmra.mxu1 %vm98_vm1, %v17_v5  ;;  %197 = vmatpush3.msra.mxu0 %v21_v6 }
   0x7   :  { %198 = vmatprep.mubr.msk.f32.mxu0 %vm211_vm2, %v210_v0 }
   0x8   :  { %199 = vmatmul.mubr.msk.f32.vlgmr.msra.gmra.mxu0 %vm24_vm3, %v20_v7 }
  0xc6   :  { %v172_v8 = vpop.f32.mrf.mxu1 }
  0xc8   :  { %v94_v9 = vpop.f32.mrf.mxu0  ;;  %v207_v10 = vpop.f32.mrf.mxu1 }
  0xc9   :  { %v173_v11 = vadd.f32 %v172_v8, %v94_v9 }
  0xca   :  { %v200_v12 = vpop.f32.mrf.mxu0 }
  0xcb   :  { %177 = vst.msk [vmem:[%s265_s4] sm:$0x3] %vm176_vm4, %v173_v11 }

// kernel: mwt_cz1d_forward.23
= control target key start
LH: loop header
LB: loop body
LE: loop exit
PB: predicated region body
PF: predicated region fallthrough
CT: control target
= control target key end

     0   :  { %v257_v0 = vmov 0.0   ;;  %vm258_vm0 = vmmov 0   ;;  %vm111_vm1 = vcmask 392192   ;;  %vm37_vm2 = vcmask 785408   ;;  %s347_s3 = inlined_call_operand.vmem [shape: f32[96,96], index: 3, kind: input, shape index: {}]   ;;  %s348_s2 = inlined_call_operand.vmem [shape: f32[48,96], index: 2, kind: input, shape index: {}]   ;;  %s349_s0 = inlined_call_operand.vmem [shape: f32[2,48], index: 0, kind: input, shape index: {}]   ;;  %s350_s1 = inlined_call_operand.vmem [shape: f32[2,96], index: 1, kind: input, shape index: {}]   ;;  %s351_s4 = inlined_call_operand.vmem [shape: f32[2,96], index: 4, kind: output, shape index: {}]  }
   0x1   :  { %213 = vmatprep.subr.mxu0 %v257_v0  ;;  %v36_v1 = vld [vmem:[%s347_s3 + $0x58] sm:$0xff]  ;;  %v35_v2 = vld [vmem:[%s347_s3 + $0x50] sm:$0xff]  ;;  %240 = vmatprep.subr.mxu1 %v257_v0  ;;  %v34_v3 = vld [vmem:[%s347_s3 + $0x48] sm:$0xff]  ;;  %vm185_vm3 = vcmask 779264  }
   0x2   :  { %214 = vmatpush3.msra.mxu0 %v36_v1  ;;  %252 = vmatprep.mubr.msk.f32.mxu1 %vm258_vm0, %v257_v0  ;;  %v23_v4 = vld [vmem:[%s348_s2 + $0x28] sm:$0xff]  ;;  %v22_v5 = vld [vmem:[%s348_s2 + $0x20] sm:$0xff]  ;;  %v21_v7 = vld [vmem:[%s348_s2 + $0x18] sm:$0xff] }
   0x3   :  { %215 = vmatprep.subr.mxu0 %v257_v0  ;;  %237 = vmatprep.mubr.msk.f32.mxu0 %vm258_vm0, %v257_v0  ;;  %v33_v6 = vld [vmem:[%s347_s3 + $0x40] sm:$0xff]  ;;  %v32_v8 = vld [vmem:[%s347_s3 + $0x38] sm:$0xff]  ;;  %v20_v9 = vld [vmem:[%s348_s2 + $0x10] sm:$0xff] }
   0x4   :  { %216 = vmatpush3.msra.mxu0 %v35_v2  ;;  %241 = vmatpush3.msra.mxu1 %v23_v4  ;;  %v31_v10 = vld [vmem:[%s347_s3 + $0x30] sm:$0xff]  ;;  %v19_v11 = vld [vmem:[%s348_s2 + $0x8] sm:$0xff]  ;;  %v18_v13 = vld [vmem:[%s348_s2] sm:$0xff] }
   0x5   :  { %217 = vmatprep.subr.mxu0 %v257_v0  ;;  %242 = vmatprep.subr.mxu1 %v257_v0  ;;  %v30_v12 = vld [vmem:[%s347_s3 + $0x28] sm:$0xff]  ;;  %v17_v14 = vld [vmem:[%s349_s0] sm:$0x3]  ;;  %v28_v16 = vld [vmem:[%s347_s3 + $0x18] sm:$0xff] }
   0x6   :  { %218 = vmatpush3.msra.mxu0 %v34_v3  ;;  %243 = vmatpush3.msra.mxu1 %v22_v5  ;;  %v29_v15 = vld [vmem:[%s347_s3 + $0x20] sm:$0xff]  ;;  %v27_v17 = vld [vmem:[%s347_s3 + $0x10] sm:$0xff]  ;;  %v26_v18 = vld [vmem:[%s347_s3 + $0x8] sm:$0xff] }
   0x7   :  { %219 = vmatprep.subr.mxu0 %v257_v0  ;;  %244 = vmatprep.subr.mxu1 %v257_v0  ;;  %v25_v19 = vld [vmem:[%s347_s3] sm:$0xff] }
   0x8   :  { %220 = vmatpush3.msra.mxu0 %v33_v6  ;;  %245 = vmatpush3.msra.mxu1 %v21_v7  ;;  %v24_v20 = vld [vmem:[%s350_s1] sm:$0x3] }
   0x9   :  { %221 = vmatprep.subr.mxu0 %v257_v0  ;;  %246 = vmatprep.subr.mxu1 %v257_v0 }
   0xa   :  { %222 = vmatpush3.msra.mxu0 %v32_v8  ;;  %247 = vmatpush3.msra.mxu1 %v20_v9 }
   0xb   :  { %223 = vmatprep.subr.mxu0 %v257_v0  ;;  %248 = vmatprep.subr.mxu1 %v257_v0 }
   0xc   :  { %224 = vmatpush3.msra.mxu0 %v31_v10  ;;  %249 = vmatpush3.msra.mxu1 %v19_v11 }
   0xd   :  { %225 = vmatprep.subr.mxu0 %v257_v0  ;;  %250 = vmatprep.subr.mxu1 %v257_v0 }
   0xe   :  { %226 = vmatpush3.msra.mxu0 %v30_v12  ;;  %251 = vmatpush3.msra.mxu1 %v18_v13 }
   0xf   :  { %227 = vmatprep.subr.mxu0 %v257_v0  ;;  %253 = vmatmul.mubr.msk.f32.vlgmr.msra.gmra.mxu1 %vm111_vm1, %v17_v14 }
  0x10   :  { %228 = vmatpush3.msra.mxu0 %v29_v15 }
  0x11   :  { %229 = vmatprep.subr.mxu0 %v257_v0 }
  0x12   :  { %230 = vmatpush3.msra.mxu0 %v28_v16 }
  0x13   :  { %231 = vmatprep.subr.mxu0 %v257_v0 }
  0x14   :  { %232 = vmatpush3.msra.mxu0 %v27_v17 }
  0x15   :  { %233 = vmatprep.subr.mxu0 %v257_v0 }
  0x16   :  { %234 = vmatpush3.msra.mxu0 %v26_v18 }
  0x17   :  { %235 = vmatprep.subr.mxu0 %v257_v0 }
  0x18   :  { %236 = vmatpush3.msra.mxu0 %v25_v19 }
  0x19   :  { %238 = vmatmul.mubr.msk.f32.vlgmr.msra.gmra.mxu0 %vm37_vm2, %v24_v20 }
  0xcf   :  { %v181_v21 = vpop.f32.mrf.mxu1 }
  0xd1   :  { %v254_v22 = vpop.f32.mrf.mxu1 }
  0xd9   :  { %v107_v23 = vpop.f32.mrf.mxu0 }
  0xda   :  { %v182_v24 = vadd.f32 %v181_v21, %v107_v23 }
  0xdb   :  { %v239_v25 = vpop.f32.mrf.mxu0 }
  0xdc   :  { %186 = vst.msk [vmem:[%s351_s4] sm:$0x3] %vm185_vm3, %v182_v24 }

// kernel: mwt_cz1d_forward.25
= control target key start
LH: loop header
LB: loop body
LE: loop exit
PB: predicated region body
PF: predicated region fallthrough
CT: control target
= control target key end

     0   :  { %v274_v3 = vmov 0.0   ;;  %vm175_vm0 = vcmask 785408   ;;  %vm101_vm1 = vcmask 523264   ;;  %vm261_vm2 = vcmask 1041408   ;;  %s526_s3 = inlined_call_operand.vmem [shape: f32[192,192], index: 3, kind: input, shape index: {}]   ;;  %s527_s2 = inlined_call_operand.vmem [shape: f32[96,192], index: 2, kind: input, shape index: {}]   ;;  %s528_s1 = inlined_call_operand.vmem [shape: f32[2,192], index: 1, kind: input, shape index: {}]   ;;  %s529_s0 = inlined_call_operand.vmem [shape: f32[2,96], index: 0, kind: input, shape index: {}]   ;;  %s530_s4 = inlined_call_operand.vmem [shape: f32[2,192], index: 4, kind: output, shape index: {}]  }
   0x1   :  { %v74_v0 = vld [vmem:[%s526_s3 + $0xf8] sm:$0xff]  ;;  %v73_v1 = vld [vmem:[%s526_s3 + $0xf0] sm:$0xff]  ;;  %v72_v2 = vld [vmem:[%s526_s3 + $0xe8] sm:$0xff]  ;;  %243 = vmatprep.mubr.f32.mxu1 %v274_v3  ;;  %vm262_vm3 = vcmask 519170  }
   0x2   :  { %104 = vmatprep.subr.mxu0 %v74_v0  ;;  %v71_v4 = vld [vmem:[%s526_s3 + $0xe0] sm:$0xff]  ;;  %v70_v5 = vld [vmem:[%s526_s3 + $0xd8] sm:$0xff]  ;;  %v69_v6 = vld [vmem:[%s526_s3 + $0xd0] sm:$0xff] }
   0x3   :  { %105 = vmatpush1.msra.mxu0 %v73_v1  ;;  %v68_v7 = vld [vmem:[%s526_s3 + $0xc8] sm:$0xff]  ;;  %v67_v8 = vld [vmem:[%s526_s3 + $0xc0] sm:$0xff]  ;;  %v66_v9 = vld [vmem:[%s526_s3 + $0xb8] sm:$0xff] }
   0x4   :  { %106 = vmatprep.subr.mxu0 %v72_v2  ;;  %v65_v10 = vld [vmem:[%s526_s3 + $0xb0] sm:$0xff]  ;;  %v41_v11 = vld [vmem:[%s527_s2 + $0xb8] sm:$0xff]  ;;  %v64_v12 = vld [vmem:[%s526_s3 + $0xa8] sm:$0xff] }
   0x5   :  { %107 = vmatpush1.msra.mxu0 %v71_v4  ;;  %187 = vmatprep.subr.mxu1 %v41_v11  ;;  %v40_v13 = vld [vmem:[%s527_s2 + $0xb0] sm:$0xff]  ;;  %v63_v14 = vld [vmem:[%s526_s3 + $0xa0] sm:$0xff]  ;;  %v39_v15 = vld [vmem:[%s527_s2 + $0xa8] sm:$0xff] }
   0x6   :  { %108 = vmatprep.subr.mxu0 %v70_v5  ;;  %188 = vmatpush1.msra.mxu1 %v40_v13  ;;  %v38_v16 = vld [vmem:[%s527_s2 + $0xa0] sm:$0xff]  ;;  %v62_v17 = vld [vmem:[%s526_s3 + $0x98] sm:$0xff]  ;;  %v61_v19 = vld [vmem:[%s526_s3 + $0x90] sm:$0xff] }
   0x7   :  { %109 = vmatpush1.msra.mxu0 %v69_v6  ;;  %189 = vmatprep.subr.mxu1 %v39_v15  ;;  %v37_v18 = vld [vmem:[%s527_s2 + $0x98] sm:$0xff]  ;;  %v36_v20 = vld [vmem:[%s527_s2 + $0x90] sm:$0xff]  ;;  %v35_v21 = vld [vmem:[%s527_s2 + $0x88] sm:$0xff] }
   0x8   :  { %110 = vmatprep.subr.mxu0 %v68_v7  ;;  %190 = vmatpush1.msra.mxu1 %v38_v16  ;;  %v60_v22 = vld [vmem:[%s526_s3 + $0x88] sm:$0xff]  ;;  %v34_v23 = vld [vmem:[%s527_s2 + $0x80] sm:$0xff]  ;;  %v33_v25 = vld [vmem:[%s527_s2 + $0x78] sm:$0xff] }
   0x9   :  { %111 = vmatpush1.msra.mxu0 %v67_v8  ;;  %191 = vmatprep.subr.mxu1 %v37_v18  ;;  %v59_v24 = vld [vmem:[%s526_s3 + $0x80] sm:$0xff]  ;;  %v58_v26 = vld [vmem:[%s526_s3 + $0x78] sm:$0xff]  ;;  %v32_v27 = vld [vmem:[%s527_s2 + $0x70] sm:$0xff] }
   0xa   :  { %112 = vmatprep.subr.mxu0 %v66_v9  ;;  %192 = vmatpush1.msra.mxu1 %v36_v20  ;;  %v57_v28 = vld [vmem:[%s526_s3 + $0x70] sm:$0xff]  ;;  %v31_v29 = vld [vmem:[%s527_s2 + $0x68] sm:$0xff]  ;;  %v30_v31 = vld [vmem:[%s527_s2 + $0x60] sm:$0xff] }
   0xb   :  { %113 = vmatpush1.msra.mxu0 %v65_v10  ;;  %193 = vmatprep.subr.mxu1 %v35_v21  ;;  %v56_v30 = vld [vmem:[%s526_s3 + $0x68] sm:$0xff]  ;;  %v55_v32 = vld [vmem:[%s526_s3 + $0x60] sm:$0xff]  ;;  %v29_v33 = vld [vmem:[%s527_s2 + $0x58] sm:$0xff] }
   0xc   :  { %114 = vmatprep.subr.mxu0 %v64_v12  ;;  %194 = vmatpush1.msra.mxu1 %v34_v23  ;;  %v54_v34 = vld [vmem:[%s526_s3 + $0x58] sm:$0xff]  ;;  %v28_v35 = vld [vmem:[%s527_s2 + $0x50] sm:$0xff]  ;;  %v27_v37 = vld [vmem:[%s527_s2 + $0x48] sm:$0xff]  ;;  %v275_v12 = vmov 1983009808  }
   0xd   :  { %115 = vmatpush1.msra.mxu0 %v63_v14  ;;  %195 = vmatprep.subr.mxu1 %v33_v25  ;;  %v53_v36 = vld [vmem:[%s526_s3 + $0x50] sm:$0xff]  ;;  %v52_v38 = vld [vmem:[%s526_s3 + $0x48] sm:$0xff]  ;;  %v26_v39 = vld [vmem:[%s527_s2 + $0x40] sm:$0xff]  ;;  %v254_v13 = vunpack.c.l.s4 %v275_v12  ;;  %v256_v14 = vlaneseq }
   0xe   :  { %116 = vmatprep.subr.mxu0 %v62_v17  ;;  %196 = vmatpush1.msra.mxu1 %v32_v27  ;;  %v51_v40 = vld [vmem:[%s526_s3 + $0x40] sm:$0xff]  ;;  %v25_v41 = vld [vmem:[%s527_s2 + $0x38] sm:$0xff]  ;;  %v24_v43 = vld [vmem:[%s527_s2 + $0x30] sm:$0xff] }
   0xf   :  { %117 = vmatpush1.msra.mxu0 %v61_v19  ;;  %197 = vmatprep.subr.mxu1 %v31_v29  ;;  %v50_v42 = vld [vmem:[%s526_s3 + $0x38] sm:$0xff]  ;;  %v49_v44 = vld [vmem:[%s526_s3 + $0x30] sm:$0xff]  ;;  %v23_v45 = vld [vmem:[%s527_s2 + $0x28] sm:$0xff]  ;;  %v255_v16 = vunpack.c.0.s8 %v254_v13  ;;  %v257_v17 = vshrl.u32 %v256_v14, 7 }
  0x10   :  { %118 = vmatprep.subr.mxu0 %v60_v22  ;;  %198 = vmatpush1.msra.mxu1 %v30_v31  ;;  %v48_v46 = vld [vmem:[%s526_s3 + $0x28] sm:$0xff]  ;;  %v22_v47 = vld [vmem:[%s527_s2 + $0x20] sm:$0xff]  ;;  %v21_v49 = vld [vmem:[%s527_s2 + $0x18] sm:$0xff] }
  0x11   :  { %119 = vmatpush1.msra.mxu0 %v59_v24  ;;  %199 = vmatprep.subr.mxu1 %v29_v33  ;;  %v47_v48 = vld [vmem:[%s526_s3 + $0x20] sm:$0xff]  ;;  %v46_v50 = vld [vmem:[%s526_s3 + $0x18] sm:$0xff]  ;;  %v20_v51 = vld [vmem:[%s527_s2 + $0x10] sm:$0xff]  ;;  %v258_v21 = vsub.s32 %v255_v16, %v257_v17 }
  0x12   :  { %120 = vmatprep.subr.mxu0 %v58_v26  ;;  %200 = vmatpush1.msra.mxu1 %v28_v35  ;;  %v269_v52 = vld.sshfl [vmem:[%s528_s1] sm:$0x33 pattern:$0x76325410]  ;;  %v45_v53 = vld [vmem:[%s526_s3 + $0x10] sm:$0xff]  ;;  %v19_v54 = vld [vmem:[%s527_s2 + $0x8] sm:$0xff] }
  0x13   :  { %121 = vmatpush1.msra.mxu0 %v57_v28  ;;  %201 = vmatprep.subr.mxu1 %v27_v37  ;;  %v44_v55 = vld [vmem:[%s526_s3 + $0x8] sm:$0xff]  ;;  %v18_v56 = vld [vmem:[%s527_s2] sm:$0xff]  ;;  %v99_v59 = vcombine.high %v269_v52, %v269_v52  ;;  %v90_v60 = vld [vmem:[%s526_s3 + $0x178] sm:$0xff] }
  0x14   :  { %122 = vmatprep.subr.mxu0 %v56_v30  ;;  %202 = vmatpush1.msra.mxu1 %v26_v39  ;;  %v43_v57 = vld [vmem:[%s526_s3] sm:$0xff]  ;;  %v89_v61 = vld [vmem:[%s526_s3 + $0x170] sm:$0xff]  ;;  %v88_v62 = vld [vmem:[%s526_s3 + $0x168] sm:$0xff] }
  0x15   :  { %123 = vmatpush1.msra.mxu0 %v55_v32  ;;  %203 = vmatprep.subr.mxu1 %v25_v41  ;;  %v17_v58 = vld [vmem:[%s529_s0] sm:$0x3]  ;;  %v86_v0 = vld [vmem:[%s526_s3 + $0x158] sm:$0xff]  ;;  %v85_v1 = vld [vmem:[%s526_s3 + $0x150] sm:$0xff] }
  0x16   :  { %124 = vmatprep.subr.mxu0 %v54_v34  ;;  %204 = vmatpush1.msra.mxu1 %v24_v43  ;;  %v87_v63 = vld [vmem:[%s526_s3 + $0x160] sm:$0xff]  ;;  %v84_v2 = vld [vmem:[%s526_s3 + $0x148] sm:$0xff]  ;;  %v82_v4 = vld [vmem:[%s526_s3 + $0x138] sm:$0xff] }
  0x17   :  { %125 = vmatpush1.msra.mxu0 %v53_v36  ;;  %205 = vmatprep.subr.mxu1 %v23_v45  ;;  %v83_v3 = vld [vmem:[%s526_s3 + $0x140] sm:$0xff]  ;;  %v81_v5 = vld [vmem:[%s526_s3 + $0x130] sm:$0xff]  ;;  %v80_v6 = vld [vmem:[%s526_s3 + $0x128] sm:$0xff] }
  0x18   :  { %126 = vmatprep.subr.mxu0 %v52_v38  ;;  %206 = vmatpush1.msra.mxu1 %v22_v47  ;;  %v79_v7 = vld [vmem:[%s526_s3 + $0x120] sm:$0xff]  ;;  %v78_v8 = vld [vmem:[%s526_s3 + $0x118] sm:$0xff]  ;;  %v77_v9 = vld [vmem:[%s526_s3 + $0x110] sm:$0xff] }
  0x19   :  { %127 = vmatpush1.msra.mxu0 %v51_v40  ;;  %207 = vmatprep.subr.mxu1 %v21_v49  ;;  %v76_v10 = vld [vmem:[%s526_s3 + $0x108] sm:$0xff]  ;;  %v75_v11 = vld [vmem:[%s526_s3 + $0x100] sm:$0xff]  ;;  %vm263_vm4 = vmor %vm262_vm3, %vm261_vm2 }
  0x1a   :  { %128 = vmatprep.subr.mxu0 %v50_v42  ;;  %208 = vmatpush1.msra.mxu1 %v20_v51 }
  0x1b   :  { %129 = vmatpush1.msra.mxu0 %v49_v44  ;;  %209 = vmatprep.subr.mxu1 %v19_v54 }
  0x1c   :  { %130 = vmatprep.subr.mxu0 %v48_v46  ;;  %210 = vmatpush1.msra.mxu1 %v18_v56 }
  0x1d   :  { %131 = vmatpush1.msra.mxu0 %v47_v48  ;;  %271 = vmatmul.mubr.msk.f32.vlgmr.msra.gmra.mxu1 %vm175_vm0, %v17_v58 }
  0x1e   :  { %132 = vmatprep.subr.mxu0 %v46_v50  ;;  %270 = vmatprep.mubr.msk.f32.mxu0 %vm101_vm1, %v99_v59 }
  0x1f   :  { %133 = vmatpush1.msra.mxu0 %v45_v53 }
  0x20   :  { %134 = vmatprep.subr.mxu0 %v44_v55 }
  0x21   :  { %135 = vmatpush1.msra.mxu0 %v43_v57 }
  0x22   :  { %152 = vmatprep.subr.mxu0 %v90_v60 }
  0x23   :  { %153 = vmatpush2.msra.mxu0 %v89_v61 }
  0x24   :  { %154 = vmatprep.subr.mxu0 %v88_v62 }
  0x25   :  { %155 = vmatpush2.msra.mxu0 %v87_v63 }
  0x26   :  { %156 = vmatprep.subr.mxu0 %v86_v0 }
  0x27   :  { %157 = vmatpush2.msra.mxu0 %v85_v1 }
  0x28   :  { %158 = vmatprep.subr.mxu0 %v84_v2 }
  0x29   :  { %159 = vmatpush2.msra.mxu0 %v83_v3 }
  0x2a   :  { %160 = vmatprep.subr.mxu0 %v82_v4 }
  0x2b   :  { %161 = vmatpush2.msra.mxu0 %v81_v5 }
  0x2c   :  { %162 = vmatprep.subr.mxu0 %v80_v6 }
  0x2d   :  { %163 = vmatpush2.msra.mxu0 %v79_v7 }
  0x2e   :  { %164 = vmatprep.subr.mxu0 %v78_v8 }
  0x2f   :  { %165 = vmatpush2.msra.mxu0 %v77_v9 }
  0x30   :  { %166 = vmatprep.subr.mxu0 %v76_v10 }
  0x31   :  { %167 = vmatpush2.msra.mxu0 %v75_v11 }
  0x32   :  { %169 = vmatmul.mubr.f32.vlgmr.msra.gmra.mxu0 %v269_v52 }
  0xdd   :  { %v245_v15 = vpop.f32.mrf.mxu1 }
  0xdf   :  { %v247_v19 = vpop.f32.mrf.mxu1 }
  0xf2   :  { %v170_v18 = vpop.f32.mrf.mxu0 }
  0xf3   :  { %v246_v22 = vadd.f32 %v245_v15, %v170_v18 }
  0xf4   :  { %v172_v20 = vpop.f32.mrf.mxu0 }
  0xf5   :  { %v248_v23 = vadd.f32 %v247_v19, %v172_v20 }
  0xf7   :  { %v252_v24 = vcombine.low %v246_v22, %v248_v23 }
  0xf9   :  { %v259_v25 = vrot.slane %v252_v24, %v258_v21 }
  0xfb   :  { %264 = vst.msk [vmem:[%s530_s4] sm:$0xf] %vm263_vm4, %v259_v25 }

</bundles_post_ra>
